<compile_context>
chip_gen: v5e
topology: v5e:2x2
jax: 0.10.0
libtpu: 0.0.40
codegen_flags: <defaults>
</compile_context>

<pallas_src>
import functools

import jax
import jax.numpy as jnp
import numpy as np
from jax.experimental import pallas as pl
from jax.experimental.pallas import tpu as pltpu

SUBLANE = 8    # f32 sublane tile
LANE = 128     # lane tile


def _round_up(x, m):
  return (x + m - 1) // m * m


# ---------------------------------------------------------------------------
# Pallas kernel: fused L-layer LSTM + final Linear, single invocation (no grid)
# ---------------------------------------------------------------------------
def fused_lstm_fc_kernel(x_ref, wih0_ref, whh0_ref, b0_ref,
                         wih_r_ref, whh_r_ref, b_r_ref,
                         h0_ref, c0_ref, wfc_ref, bfc_ref,
                         o_ref, gx_ref, hbuf_ref):
  """Shapes (B = padded batch, multiple of 8; 4H == 128 -> lane aligned):
     x_ref     : (S*B, D)        bf16  time-major input, flattened over (t, b)
     wih0_ref  : (D, 4H)         bf16  layer-0 W_ih^T
     whh0_ref  : (H, 4H)         bf16  layer-0 W_hh^T
     b0_ref    : (1, 4H)         f32   layer-0 (b_ih + b_hh)
     wih_r_ref : (max(L-1,1), H, 4H) bf16  W_ih^T, layers 1..L-1
     whh_r_ref : (max(L-1,1), H, 4H) bf16  W_hh^T, layers 1..L-1
     b_r_ref   : (max(L-1,1), 1, 4H) f32   merged biases, layers 1..L-1
     h0_ref    : (L, B, H)       f32   initial hidden states
     c0_ref    : (L, B, H)       f32   initial cell states
     wfc_ref   : (H, O_pad)      bf16  FC weight, transposed + lane padded
     bfc_ref   : (1, O_pad)      f32   FC bias, lane padded
     o_ref     : (B, O_pad)      f32   output (lane padded)
     gx_ref    : (S*B, 4H)       f32   VMEM scratch: input projection of layer
     hbuf_ref  : (S*B, H)        f32   VMEM scratch: hidden sequence of layer
  """
  L, B, H = h0_ref.shape
  S = x_ref.shape[0] // B

  def cell(gates, c):
    # PyTorch gate order (i, f, g, o); 4H == 128 -> one lane group.
    # Two full-width EUP pushes (sigmoid + tanh) instead of four quarter-width
    # ones; the column selections run on otherwise-idle VPU/XLU slots.
    sg = jax.nn.sigmoid(gates)
    tg = jnp.tanh(gates)
    i_g = sg[:, 0 * H:1 * H]
    f_g = sg[:, 1 * H:2 * H]
    o_g = sg[:, 3 * H:4 * H]
    g_g = tg[:, 2 * H:3 * H]
    c_new = f_g * c + i_g * g_g
    h_new = o_g * jnp.tanh(c_new)
    return h_new, c_new

  def run_layer(layer):
    """Recurrence over the precomputed input projection held in gx_ref."""
    h = h0_ref[layer]
    c = c0_ref[layer]
    whh = whh0_ref[...] if layer == 0 else whh_r_ref[layer - 1]  # hoisted
    keep_seq = layer < L - 1            # only needed as next layer's input
    # TODO(synk): switch to lax.fori_loop(..., unroll=k) if S grows large.
    for t in range(S):                  # S static & small -> fully unrolled
      row = t * B                       # B % 8 == 0 -> aligned row slices
      gates = gx_ref[row:row + B, :] + jnp.dot(
          h.astype(jnp.bfloat16), whh, preferred_element_type=jnp.float32)
      h, c = cell(gates, c)
      if keep_seq:
        hbuf_ref[row:row + B, :] = h    # aligned, unmasked f32 store
    return h

  # ---- layer 0: one MXU-friendly (S*B, D) x (D, 4H) input projection (off
  #      the serial path), then the cheap recurrence (h @ Whh^T + gating). ----
  gx_ref[...] = jnp.dot(x_ref[...], wih0_ref[...],
                        preferred_element_type=jnp.float32) + b0_ref[...]
  h_last = run_layer(0)

  # ---- layers 1 .. L-1: input is previous layer's VMEM-resident sequence ----
  for layer in range(1, L):
    gx_ref[...] = (jnp.dot(hbuf_ref[...].astype(jnp.bfloat16),
                           wih_r_ref[layer - 1],
                           preferred_element_type=jnp.float32)
                   + b_r_ref[layer - 1])
    h_last = run_layer(layer)

  # ---- fused FC head on the final timestep of the top layer ----
  o_ref[...] = (jnp.dot(h_last.astype(jnp.bfloat16), wfc_ref[...],
                        preferred_element_type=jnp.float32)
                + bfc_ref[...]).astype(o_ref.dtype)


# ---------------------------------------------------------------------------
# One-time parameter packing (kept OFF the per-call path)
# ---------------------------------------------------------------------------
def pack_params(lstm_params, fc_params, hidden_size, num_layers):
  H = hidden_size
  wih0_t, whh0_t, b0 = lstm_params[0]
  wih0 = wih0_t.astype(jnp.bfloat16)
  whh0 = whh0_t.astype(jnp.bfloat16)
  b0 = b0.astype(jnp.float32)
  if num_layers > 1:
    wih_r = jnp.stack([p[0] for p in lstm_params[1:]]).astype(jnp.bfloat16)
    whh_r = jnp.stack([p[1] for p in lstm_params[1:]]).astype(jnp.bfloat16)
    b_r = jnp.stack([p[2] for p in lstm_params[1:]]).astype(jnp.float32)
  else:  # dummies (never read in-kernel); keep the signature fixed
    wih_r = jnp.zeros((1, H, 4 * H), jnp.bfloat16)
    whh_r = jnp.zeros((1, H, 4 * H), jnp.bfloat16)
    b_r = jnp.zeros((1, 1, 4 * H), jnp.float32)

  w_fc_t, b_fc = fc_params
  O = w_fc_t.shape[1]
  O_pad = _round_up(max(O, LANE), LANE)      # lane-dense output store
  wfc = jnp.zeros((H, O_pad), jnp.bfloat16).at[:, :O].set(
      w_fc_t.astype(jnp.bfloat16))
  bfc = jnp.zeros((1, O_pad), jnp.float32).at[:, :O].set(
      b_fc.reshape(1, O).astype(jnp.float32))
  return (wih0, whh0, b0, wih_r, whh_r, b_r, wfc, bfc)


# ---------------------------------------------------------------------------
# Forward wrapper
# ---------------------------------------------------------------------------
@functools.partial(jax.jit, static_argnames=("output_size",))
def lstm_model_forward(sequences, packed_params, h0, c0, *, output_size):
  """sequences: (B, seq_len, input_size).  Returns (B, output_size)."""
  B, S, D = sequences.shape
  L, _, H = h0.shape
  wih0, whh0, b0, wih_r, whh_r, b_r, wfc, bfc = packed_params
  O_pad = wfc.shape[1]

  # Pad batch up to the f32 sublane tile so every per-timestep slice / store
  # inside the kernel is whole-vreg aligned.  Extra rows are discarded.
  B_pad = _round_up(B, SUBLANE)
  pad = B_pad - B
  seq_p = jnp.pad(sequences.astype(jnp.float32), ((0, pad), (0, 0), (0, 0)))
  h0_p = jnp.pad(h0.astype(jnp.float32), ((0, 0), (0, pad), (0, 0)))
  c0_p = jnp.pad(c0.astype(jnp.float32), ((0, 0), (0, pad), (0, 0)))

  # sequences.view(B,S,-1).transpose(1,0) -> time-major, flattened to (S*B, D)
  # so the layer-0 input projection is a single matmul.
  x = jnp.transpose(seq_p, (1, 0, 2)).reshape(S * B_pad, D).astype(jnp.bfloat16)

  # Rough cost hint so XLA can schedule surrounding ops around the fused call.
  flops = (2 * S * B_pad * 4 * H * (D + (L - 1) * H + L * H)
           + 2 * B_pad * H * O_pad)
  trans = S * L * B_pad * (4 * H + 4 * H + H)
  bytes_acc = sum(int(np.prod(a.shape)) * a.dtype.itemsize
                  for a in (x, wih0, whh0, b0, wih_r, whh_r, b_r,
                            h0_p, c0_p, wfc, bfc)) + B_pad * O_pad * 4

  out = pl.pallas_call(
      fused_lstm_fc_kernel,
      out_shape=jax.ShapeDtypeStruct((B_pad, O_pad), jnp.float32),
      in_specs=[pl.BlockSpec(memory_space=pltpu.MemorySpace.VMEM)] * 11,
      out_specs=pl.BlockSpec(memory_space=pltpu.MemorySpace.VMEM),
      scratch_shapes=[pltpu.VMEM((S * B_pad, 4 * H), jnp.float32),   # gx
                      pltpu.VMEM((S * B_pad, H), jnp.float32)],      # hbuf
      compiler_params=pltpu.CompilerParams(
          vmem_limit_bytes=32 * 1024 * 1024),
      cost_estimate=pl.CostEstimate(flops=int(flops),
                                    transcendentals=int(trans),
                                    bytes_accessed=int(bytes_acc)),
  )(x, wih0, whh0, b0, wih_r, whh_r, b_r, h0_p, c0_p, wfc, bfc)

  return out[:B, :output_size]


# ---------------------------------------------------------------------------
# Pure-JAX reference (mirrors the kernel's bf16-weight / f32-accum matmuls)
# ---------------------------------------------------------------------------
def lstm_model_ref(sequences, lstm_params, fc_params, h0, c0, num_layers):
  x = jnp.transpose(sequences, (1, 0, 2)).astype(jnp.bfloat16)
  h_last = None
  for layer in range(num_layers):
    wih_t, whh_t, b = lstm_params[layer]
    wih_t = wih_t.astype(jnp.bfloat16)
    whh_t = whh_t.astype(jnp.bfloat16)
    H = whh_t.shape[0]

    def step(carry, xt):
      h, c = carry
      gates = (jnp.dot(xt, wih_t, preferred_element_type=jnp.float32)
               + jnp.dot(h.astype(jnp.bfloat16), whh_t,
                         preferred_element_type=jnp.float32) + b)
      i = jax.nn.sigmoid(gates[:, 0 * H:1 * H])
      f = jax.nn.sigmoid(gates[:, 1 * H:2 * H])
      g = jnp.tanh(gates[:, 2 * H:3 * H])
      o = jax.nn.sigmoid(gates[:, 3 * H:4 * H])
      c2 = f * c + i * g
      h2 = o * jnp.tanh(c2)
      return (h2, c2), h2

    (_, _), hs = jax.lax.scan(step, (h0[layer], c0[layer]), x)
    h_last = hs[-1]
    x = hs.astype(jnp.bfloat16)

  w_fc_t, b_fc = fc_params
  return (jnp.dot(h_last.astype(jnp.bfloat16), w_fc_t.astype(jnp.bfloat16),
                  preferred_element_type=jnp.float32) + b_fc)


# ---------------------------------------------------------------------------
# Main
# ---------------------------------------------------------------------------
if __name__ == "__main__":
  batch = 4
  seq_len = 8
  input_size = 16
  hidden_size = 32
  output_size = 8
  num_layers = 2

  key = jax.random.PRNGKey(0)
  keys = iter(jax.random.split(key, 32))
  bound = 1.0 / np.sqrt(hidden_size)

  def uniform(shape):
    return jax.random.uniform(next(keys), shape, jnp.float32, -bound, bound)

  # LSTM parameters (PyTorch layout W_ih: (4H, D_in); stored transposed).
  lstm_params = []
  for layer in range(num_layers):
    d_in = input_size if layer == 0 else hidden_size
    w_ih_t = uniform((d_in, 4 * hidden_size))           # = W_ih^T
    w_hh_t = uniform((hidden_size, 4 * hidden_size))    # = W_hh^T
    b_ih = uniform((4 * hidden_size,))
    b_hh = uniform((4 * hidden_size,))
    b = (b_ih + b_hh).reshape(1, 4 * hidden_size)
    lstm_params.append((w_ih_t, w_hh_t, b))
  lstm_params = tuple(lstm_params)

  # FC parameters (PyTorch Linear: W (O, H); stored transposed).
  w_fc_t = uniform((hidden_size, output_size))
  b_fc = uniform((output_size,)).reshape(1, output_size)
  fc_params = (w_fc_t, b_fc)

  # One-time weight packing (stack / cast / pad) -- off the per-call path.
  packed = pack_params(lstm_params, fc_params, hidden_size, num_layers)

  # The PyTorch forward draws a fresh random (h0, c0) each call; here we draw
  # them once, deterministically.
  h0 = jax.random.normal(next(keys), (num_layers, batch, hidden_size),
                         jnp.float32)
  c0 = jax.random.normal(next(keys), (num_layers, batch, hidden_size),
                         jnp.float32)

  # Input: (batch, seq_len, input_size)
  sequences = jax.random.normal(next(keys), (batch, seq_len, input_size),
                                jnp.float32)

  y = lstm_model_forward(sequences, packed, h0, c0, output_size=output_size)
  y = jax.block_until_ready(y)
  assert y.shape == (batch, output_size)

  y_ref = lstm_model_ref(sequences, lstm_params, fc_params, h0, c0, num_layers)
  np.testing.assert_allclose(np.asarray(y),
                             np.asarray(y_ref, dtype=np.float32),
                             rtol=1e-3, atol=1e-3)

  print("KERNEL_OK")
</pallas_src>

<mosaic_0001>
module attributes {stable_mosaic.version = 11 : i64} {
  func.func @fused_lstm_fc_kernel(%arg0: memref<64x16xbf16, #tpu.memory_space<vmem>>, %arg1: memref<16x128xbf16, #tpu.memory_space<vmem>>, %arg2: memref<32x128xbf16, #tpu.memory_space<vmem>>, %arg3: memref<1x128xf32, #tpu.memory_space<vmem>>, %arg4: memref<1x32x128xbf16, #tpu.memory_space<vmem>>, %arg5: memref<1x32x128xbf16, #tpu.memory_space<vmem>>, %arg6: memref<1x1x128xf32, #tpu.memory_space<vmem>>, %arg7: memref<2x8x32xf32, #tpu.memory_space<vmem>>, %arg8: memref<2x8x32xf32, #tpu.memory_space<vmem>>, %arg9: memref<32x128xbf16, #tpu.memory_space<vmem>>, %arg10: memref<1x128xf32, #tpu.memory_space<vmem>>, %arg11: memref<8x128xf32, #tpu.memory_space<vmem>>, %arg12: memref<64x128xf32, #tpu.memory_space<vmem>>, %arg13: memref<64x32xf32, #tpu.memory_space<vmem>>) attributes {dimension_semantics = [], scalar_prefetch = 0 : i64, scratch_operands = 2 : i64, tpu.core_type = #tpu.core_type<tc>} {
    %c0 = arith.constant 0 : index
    %c0_0 = arith.constant 0 : index
    %0 = vector.load %arg0[%c0, %c0_0] : memref<64x16xbf16, #tpu.memory_space<vmem>>, vector<64x16xbf16>
    %c0_1 = arith.constant 0 : index
    %c0_2 = arith.constant 0 : index
    %1 = vector.load %arg1[%c0_1, %c0_2] : memref<16x128xbf16, #tpu.memory_space<vmem>>, vector<16x128xbf16>
    %cst = arith.constant dense<0.000000e+00> : vector<64x128xf32>
    %2 = tpu.matmul %0, %1, %cst {dimension_numbers = #tpu.dot_dimension_numbers<[1], [0], [0], [1], [0, 0, 1, 1], [], []>} : vector<64x16xbf16>, vector<16x128xbf16>, vector<64x128xf32> -> vector<64x128xf32>
    %c0_3 = arith.constant 0 : index
    %c0_4 = arith.constant 0 : index
    %3 = vector.load %arg3[%c0_3, %c0_4] : memref<1x128xf32, #tpu.memory_space<vmem>>, vector<1x128xf32>
    %4 = vector.broadcast %3 : vector<1x128xf32> to vector<64x128xf32>
    %5 = arith.addf %2, %4 : vector<64x128xf32>
    %c0_5 = arith.constant 0 : index
    %c0_6 = arith.constant 0 : index
    %6 = vector.load %arg12[%c0_5, %c0_6] : memref<64x128xf32, #tpu.memory_space<vmem>>, vector<64x128xf32>
    tpu.vector_store %arg12[%c0_5, %c0_6], %5 {strides = array<i32>} : memref<64x128xf32, #tpu.memory_space<vmem>>, vector<64x128xf32>,
    %c0_7 = arith.constant 0 : index
    %c0_8 = arith.constant 0 : index
    %c0_9 = arith.constant 0 : index
    %7 = vector.load %arg7[%c0_7, %c0_8, %c0_9] : memref<2x8x32xf32, #tpu.memory_space<vmem>>, vector<1x8x32xf32>
    %8 = vector.shape_cast %7 : vector<1x8x32xf32> to vector<8x32xf32>
    %c0_10 = arith.constant 0 : index
    %c0_11 = arith.constant 0 : index
    %c0_12 = arith.constant 0 : index
    %9 = vector.load %arg8[%c0_10, %c0_11, %c0_12] : memref<2x8x32xf32, #tpu.memory_space<vmem>>, vector<1x8x32xf32>
    %10 = vector.shape_cast %9 : vector<1x8x32xf32> to vector<8x32xf32>
    %c0_13 = arith.constant 0 : index
    %c0_14 = arith.constant 0 : index
    %11 = vector.load %arg2[%c0_13, %c0_14] : memref<32x128xbf16, #tpu.memory_space<vmem>>, vector<32x128xbf16>
    %c0_15 = arith.constant 0 : index
    %c0_16 = arith.constant 0 : index
    %12 = vector.load %arg12[%c0_15, %c0_16] : memref<64x128xf32, #tpu.memory_space<vmem>>, vector<8x128xf32>
    %13 = arith.truncf %8 : vector<8x32xf32> to vector<8x32xbf16>
    %cst_17 = arith.constant dense<0.000000e+00> : vector<8x128xf32>
    %14 = tpu.matmul %13, %11, %cst_17 {dimension_numbers = #tpu.dot_dimension_numbers<[1], [0], [0], [1], [0, 0, 1, 1], [], []>} : vector<8x32xbf16>, vector<32x128xbf16>, vector<8x128xf32> -> vector<8x128xf32>
    %15 = arith.addf %12, %14 : vector<8x128xf32>
    %16 = arith.negf %15 : vector<8x128xf32>
    %17 = math.exp %16 : vector<8x128xf32>
    %cst_18 = arith.constant 1.000000e+00 : f32
    %18 = vector.broadcast %cst_18 : f32 to vector<8x128xf32>
    %19 = arith.addf %18, %17 : vector<8x128xf32>
    %20 = arith.divf %18, %19 : vector<8x128xf32>
    %21 = math.tanh %15 : vector<8x128xf32>
    %22 = vector.extract_strided_slice %20 {offsets = [0, 0], sizes = [8, 32], strides = [1, 1]} : vector<8x128xf32> to vector<8x32xf32>
    %23 = vector.extract_strided_slice %20 {offsets = [0, 32], sizes = [8, 32], strides = [1, 1]} : vector<8x128xf32> to vector<8x32xf32>
    %24 = vector.extract_strided_slice %20 {offsets = [0, 96], sizes = [8, 32], strides = [1, 1]} : vector<8x128xf32> to vector<8x32xf32>
    %25 = vector.extract_strided_slice %21 {offsets = [0, 64], sizes = [8, 32], strides = [1, 1]} : vector<8x128xf32> to vector<8x32xf32>
    %26 = arith.mulf %23, %10 : vector<8x32xf32>
    %27 = arith.mulf %22, %25 : vector<8x32xf32>
    %28 = arith.addf %26, %27 : vector<8x32xf32>
    %29 = math.tanh %28 : vector<8x32xf32>
    %30 = arith.mulf %24, %29 : vector<8x32xf32>
    %c0_19 = arith.constant 0 : index
    %c0_20 = arith.constant 0 : index
    %31 = vector.load %arg13[%c0_19, %c0_20] : memref<64x32xf32, #tpu.memory_space<vmem>>, vector<8x32xf32>
    tpu.vector_store %arg13[%c0_19, %c0_20], %30 {strides = array<i32>} : memref<64x32xf32, #tpu.memory_space<vmem>>, vector<8x32xf32>,
    %c8 = arith.constant 8 : index
    %c0_21 = arith.constant 0 : index
    %32 = vector.load %arg12[%c8, %c0_21] : memref<64x128xf32, #tpu.memory_space<vmem>>, vector<8x128xf32>
    %33 = arith.truncf %30 : vector<8x32xf32> to vector<8x32xbf16>
    %cst_22 = arith.constant dense<0.000000e+00> : vector<8x128xf32>
    %34 = tpu.matmul %33, %11, %cst_22 {dimension_numbers = #tpu.dot_dimension_numbers<[1], [0], [0], [1], [0, 0, 1, 1], [], []>} : vector<8x32xbf16>, vector<32x128xbf16>, vector<8x128xf32> -> vector<8x128xf32>
    %35 = arith.addf %32, %34 : vector<8x128xf32>
    %36 = arith.negf %35 : vector<8x128xf32>
    %37 = math.exp %36 : vector<8x128xf32>
    %cst_23 = arith.constant 1.000000e+00 : f32
    %38 = vector.broadcast %cst_23 : f32 to vector<8x128xf32>
    %39 = arith.addf %38, %37 : vector<8x128xf32>
    %40 = arith.divf %38, %39 : vector<8x128xf32>
    %41 = math.tanh %35 : vector<8x128xf32>
    %42 = vector.extract_strided_slice %40 {offsets = [0, 0], sizes = [8, 32], strides = [1, 1]} : vector<8x128xf32> to vector<8x32xf32>
    %43 = vector.extract_strided_slice %40 {offsets = [0, 32], sizes = [8, 32], strides = [1, 1]} : vector<8x128xf32> to vector<8x32xf32>
    %44 = vector.extract_strided_slice %40 {offsets = [0, 96], sizes = [8, 32], strides = [1, 1]} : vector<8x128xf32> to vector<8x32xf32>
    %45 = vector.extract_strided_slice %41 {offsets = [0, 64], sizes = [8, 32], strides = [1, 1]} : vector<8x128xf32> to vector<8x32xf32>
    %46 = arith.mulf %43, %28 : vector<8x32xf32>
    %47 = arith.mulf %42, %45 : vector<8x32xf32>
    %48 = arith.addf %46, %47 : vector<8x32xf32>
    %49 = math.tanh %48 : vector<8x32xf32>
    %50 = arith.mulf %44, %49 : vector<8x32xf32>
    %c8_24 = arith.constant 8 : index
    %c0_25 = arith.constant 0 : index
    %51 = vector.load %arg13[%c8_24, %c0_25] : memref<64x32xf32, #tpu.memory_space<vmem>>, vector<8x32xf32>
    tpu.vector_store %arg13[%c8_24, %c0_25], %50 {strides = array<i32>} : memref<64x32xf32, #tpu.memory_space<vmem>>, vector<8x32xf32>,
    %c16 = arith.constant 16 : index
    %c0_26 = arith.constant 0 : index
    %52 = vector.load %arg12[%c16, %c0_26] : memref<64x128xf32, #tpu.memory_space<vmem>>, vector<8x128xf32>
    %53 = arith.truncf %50 : vector<8x32xf32> to vector<8x32xbf16>
    %cst_27 = arith.constant dense<0.000000e+00> : vector<8x128xf32>
    %54 = tpu.matmul %53, %11, %cst_27 {dimension_numbers = #tpu.dot_dimension_numbers<[1], [0], [0], [1], [0, 0, 1, 1], [], []>} : vector<8x32xbf16>, vector<32x128xbf16>, vector<8x128xf32> -> vector<8x128xf32>
    %55 = arith.addf %52, %54 : vector<8x128xf32>
    %56 = arith.negf %55 : vector<8x128xf32>
    %57 = math.exp %56 : vector<8x128xf32>
    %cst_28 = arith.constant 1.000000e+00 : f32
    %58 = vector.broadcast %cst_28 : f32 to vector<8x128xf32>
    %59 = arith.addf %58, %57 : vector<8x128xf32>
    %60 = arith.divf %58, %59 : vector<8x128xf32>
    %61 = math.tanh %55 : vector<8x128xf32>
    %62 = vector.extract_strided_slice %60 {offsets = [0, 0], sizes = [8, 32], strides = [1, 1]} : vector<8x128xf32> to vector<8x32xf32>
    %63 = vector.extract_strided_slice %60 {offsets = [0, 32], sizes = [8, 32], strides = [1, 1]} : vector<8x128xf32> to vector<8x32xf32>
    %64 = vector.extract_strided_slice %60 {offsets = [0, 96], sizes = [8, 32], strides = [1, 1]} : vector<8x128xf32> to vector<8x32xf32>
    %65 = vector.extract_strided_slice %61 {offsets = [0, 64], sizes = [8, 32], strides = [1, 1]} : vector<8x128xf32> to vector<8x32xf32>
    %66 = arith.mulf %63, %48 : vector<8x32xf32>
    %67 = arith.mulf %62, %65 : vector<8x32xf32>
    %68 = arith.addf %66, %67 : vector<8x32xf32>
    %69 = math.tanh %68 : vector<8x32xf32>
    %70 = arith.mulf %64, %69 : vector<8x32xf32>
    %c16_29 = arith.constant 16 : index
    %c0_30 = arith.constant 0 : index
    %71 = vector.load %arg13[%c16_29, %c0_30] : memref<64x32xf32, #tpu.memory_space<vmem>>, vector<8x32xf32>
    tpu.vector_store %arg13[%c16_29, %c0_30], %70 {strides = array<i32>} : memref<64x32xf32, #tpu.memory_space<vmem>>, vector<8x32xf32>,
    %c24 = arith.constant 24 : index
    %c0_31 = arith.constant 0 : index
    %72 = vector.load %arg12[%c24, %c0_31] : memref<64x128xf32, #tpu.memory_space<vmem>>, vector<8x128xf32>
    %73 = arith.truncf %70 : vector<8x32xf32> to vector<8x32xbf16>
    %cst_32 = arith.constant dense<0.000000e+00> : vector<8x128xf32>
    %74 = tpu.matmul %73, %11, %cst_32 {dimension_numbers = #tpu.dot_dimension_numbers<[1], [0], [0], [1], [0, 0, 1, 1], [], []>} : vector<8x32xbf16>, vector<32x128xbf16>, vector<8x128xf32> -> vector<8x128xf32>
    %75 = arith.addf %72, %74 : vector<8x128xf32>
    %76 = arith.negf %75 : vector<8x128xf32>
    %77 = math.exp %76 : vector<8x128xf32>
    %cst_33 = arith.constant 1.000000e+00 : f32
    %78 = vector.broadcast %cst_33 : f32 to vector<8x128xf32>
    %79 = arith.addf %78, %77 : vector<8x128xf32>
    %80 = arith.divf %78, %79 : vector<8x128xf32>
    %81 = math.tanh %75 : vector<8x128xf32>
    %82 = vector.extract_strided_slice %80 {offsets = [0, 0], sizes = [8, 32], strides = [1, 1]} : vector<8x128xf32> to vector<8x32xf32>
    %83 = vector.extract_strided_slice %80 {offsets = [0, 32], sizes = [8, 32], strides = [1, 1]} : vector<8x128xf32> to vector<8x32xf32>
    %84 = vector.extract_strided_slice %80 {offsets = [0, 96], sizes = [8, 32], strides = [1, 1]} : vector<8x128xf32> to vector<8x32xf32>
    %85 = vector.extract_strided_slice %81 {offsets = [0, 64], sizes = [8, 32], strides = [1, 1]} : vector<8x128xf32> to vector<8x32xf32>
    %86 = arith.mulf %83, %68 : vector<8x32xf32>
    %87 = arith.mulf %82, %85 : vector<8x32xf32>
    %88 = arith.addf %86, %87 : vector<8x32xf32>
    %89 = math.tanh %88 : vector<8x32xf32>
    %90 = arith.mulf %84, %89 : vector<8x32xf32>
    %c24_34 = arith.constant 24 : index
    %c0_35 = arith.constant 0 : index
    %91 = vector.load %arg13[%c24_34, %c0_35] : memref<64x32xf32, #tpu.memory_space<vmem>>, vector<8x32xf32>
    tpu.vector_store %arg13[%c24_34, %c0_35], %90 {strides = array<i32>} : memref<64x32xf32, #tpu.memory_space<vmem>>, vector<8x32xf32>,
    %c32 = arith.constant 32 : index
    %c0_36 = arith.constant 0 : index
    %92 = vector.load %arg12[%c32, %c0_36] : memref<64x128xf32, #tpu.memory_space<vmem>>, vector<8x128xf32>
    %93 = arith.truncf %90 : vector<8x32xf32> to vector<8x32xbf16>
    %cst_37 = arith.constant dense<0.000000e+00> : vector<8x128xf32>
    %94 = tpu.matmul %93, %11, %cst_37 {dimension_numbers = #tpu.dot_dimension_numbers<[1], [0], [0], [1], [0, 0, 1, 1], [], []>} : vector<8x32xbf16>, vector<32x128xbf16>, vector<8x128xf32> -> vector<8x128xf32>
    %95 = arith.addf %92, %94 : vector<8x128xf32>
    %96 = arith.negf %95 : vector<8x128xf32>
    %97 = math.exp %96 : vector<8x128xf32>
    %cst_38 = arith.constant 1.000000e+00 : f32
    %98 = vector.broadcast %cst_38 : f32 to vector<8x128xf32>
    %99 = arith.addf %98, %97 : vector<8x128xf32>
    %100 = arith.divf %98, %99 : vector<8x128xf32>
    %101 = math.tanh %95 : vector<8x128xf32>
    %102 = vector.extract_strided_slice %100 {offsets = [0, 0], sizes = [8, 32], strides = [1, 1]} : vector<8x128xf32> to vector<8x32xf32>
    %103 = vector.extract_strided_slice %100 {offsets = [0, 32], sizes = [8, 32], strides = [1, 1]} : vector<8x128xf32> to vector<8x32xf32>
    %104 = vector.extract_strided_slice %100 {offsets = [0, 96], sizes = [8, 32], strides = [1, 1]} : vector<8x128xf32> to vector<8x32xf32>
    %105 = vector.extract_strided_slice %101 {offsets = [0, 64], sizes = [8, 32], strides = [1, 1]} : vector<8x128xf32> to vector<8x32xf32>
    %106 = arith.mulf %103, %88 : vector<8x32xf32>
    %107 = arith.mulf %102, %105 : vector<8x32xf32>
    %108 = arith.addf %106, %107 : vector<8x32xf32>
    %109 = math.tanh %108 : vector<8x32xf32>
    %110 = arith.mulf %104, %109 : vector<8x32xf32>
    %c32_39 = arith.constant 32 : index
    %c0_40 = arith.constant 0 : index
    %111 = vector.load %arg13[%c32_39, %c0_40] : memref<64x32xf32, #tpu.memory_space<vmem>>, vector<8x32xf32>
    tpu.vector_store %arg13[%c32_39, %c0_40], %110 {strides = array<i32>} : memref<64x32xf32, #tpu.memory_space<vmem>>, vector<8x32xf32>,
    %c40 = arith.constant 40 : index
    %c0_41 = arith.constant 0 : index
    %112 = vector.load %arg12[%c40, %c0_41] : memref<64x128xf32, #tpu.memory_space<vmem>>, vector<8x128xf32>
    %113 = arith.truncf %110 : vector<8x32xf32> to vector<8x32xbf16>
    %cst_42 = arith.constant dense<0.000000e+00> : vector<8x128xf32>
    %114 = tpu.matmul %113, %11, %cst_42 {dimension_numbers = #tpu.dot_dimension_numbers<[1], [0], [0], [1], [0, 0, 1, 1], [], []>} : vector<8x32xbf16>, vector<32x128xbf16>, vector<8x128xf32> -> vector<8x128xf32>
    %115 = arith.addf %112, %114 : vector<8x128xf32>
    %116 = arith.negf %115 : vector<8x128xf32>
    %117 = math.exp %116 : vector<8x128xf32>
    %cst_43 = arith.constant 1.000000e+00 : f32
    %118 = vector.broadcast %cst_43 : f32 to vector<8x128xf32>
    %119 = arith.addf %118, %117 : vector<8x128xf32>
    %120 = arith.divf %118, %119 : vector<8x128xf32>
    %121 = math.tanh %115 : vector<8x128xf32>
    %122 = vector.extract_strided_slice %120 {offsets = [0, 0], sizes = [8, 32], strides = [1, 1]} : vector<8x128xf32> to vector<8x32xf32>
    %123 = vector.extract_strided_slice %120 {offsets = [0, 32], sizes = [8, 32], strides = [1, 1]} : vector<8x128xf32> to vector<8x32xf32>
    %124 = vector.extract_strided_slice %120 {offsets = [0, 96], sizes = [8, 32], strides = [1, 1]} : vector<8x128xf32> to vector<8x32xf32>
    %125 = vector.extract_strided_slice %121 {offsets = [0, 64], sizes = [8, 32], strides = [1, 1]} : vector<8x128xf32> to vector<8x32xf32>
    %126 = arith.mulf %123, %108 : vector<8x32xf32>
    %127 = arith.mulf %122, %125 : vector<8x32xf32>
    %128 = arith.addf %126, %127 : vector<8x32xf32>
    %129 = math.tanh %128 : vector<8x32xf32>
    %130 = arith.mulf %124, %129 : vector<8x32xf32>
    %c40_44 = arith.constant 40 : index
    %c0_45 = arith.constant 0 : index
    %131 = vector.load %arg13[%c40_44, %c0_45] : memref<64x32xf32, #tpu.memory_space<vmem>>, vector<8x32xf32>
    tpu.vector_store %arg13[%c40_44, %c0_45], %130 {strides = array<i32>} : memref<64x32xf32, #tpu.memory_space<vmem>>, vector<8x32xf32>,
    %c48 = arith.constant 48 : index
    %c0_46 = arith.constant 0 : index
    %132 = vector.load %arg12[%c48, %c0_46] : memref<64x128xf32, #tpu.memory_space<vmem>>, vector<8x128xf32>
    %133 = arith.truncf %130 : vector<8x32xf32> to vector<8x32xbf16>
    %cst_47 = arith.constant dense<0.000000e+00> : vector<8x128xf32>
    %134 = tpu.matmul %133, %11, %cst_47 {dimension_numbers = #tpu.dot_dimension_numbers<[1], [0], [0], [1], [0, 0, 1, 1], [], []>} : vector<8x32xbf16>, vector<32x128xbf16>, vector<8x128xf32> -> vector<8x128xf32>
    %135 = arith.addf %132, %134 : vector<8x128xf32>
    %136 = arith.negf %135 : vector<8x128xf32>
    %137 = math.exp %136 : vector<8x128xf32>
    %cst_48 = arith.constant 1.000000e+00 : f32
    %138 = vector.broadcast %cst_48 : f32 to vector<8x128xf32>
    %139 = arith.addf %138, %137 : vector<8x128xf32>
    %140 = arith.divf %138, %139 : vector<8x128xf32>
    %141 = math.tanh %135 : vector<8x128xf32>
    %142 = vector.extract_strided_slice %140 {offsets = [0, 0], sizes = [8, 32], strides = [1, 1]} : vector<8x128xf32> to vector<8x32xf32>
    %143 = vector.extract_strided_slice %140 {offsets = [0, 32], sizes = [8, 32], strides = [1, 1]} : vector<8x128xf32> to vector<8x32xf32>
    %144 = vector.extract_strided_slice %140 {offsets = [0, 96], sizes = [8, 32], strides = [1, 1]} : vector<8x128xf32> to vector<8x32xf32>
    %145 = vector.extract_strided_slice %141 {offsets = [0, 64], sizes = [8, 32], strides = [1, 1]} : vector<8x128xf32> to vector<8x32xf32>
    %146 = arith.mulf %143, %128 : vector<8x32xf32>
    %147 = arith.mulf %142, %145 : vector<8x32xf32>
    %148 = arith.addf %146, %147 : vector<8x32xf32>
    %149 = math.tanh %148 : vector<8x32xf32>
    %150 = arith.mulf %144, %149 : vector<8x32xf32>
    %c48_49 = arith.constant 48 : index
    %c0_50 = arith.constant 0 : index
    %151 = vector.load %arg13[%c48_49, %c0_50] : memref<64x32xf32, #tpu.memory_space<vmem>>, vector<8x32xf32>
    tpu.vector_store %arg13[%c48_49, %c0_50], %150 {strides = array<i32>} : memref<64x32xf32, #tpu.memory_space<vmem>>, vector<8x32xf32>,
    %c56 = arith.constant 56 : index
    %c0_51 = arith.constant 0 : index
    %152 = vector.load %arg12[%c56, %c0_51] : memref<64x128xf32, #tpu.memory_space<vmem>>, vector<8x128xf32>
    %153 = arith.truncf %150 : vector<8x32xf32> to vector<8x32xbf16>
    %cst_52 = arith.constant dense<0.000000e+00> : vector<8x128xf32>
    %154 = tpu.matmul %153, %11, %cst_52 {dimension_numbers = #tpu.dot_dimension_numbers<[1], [0], [0], [1], [0, 0, 1, 1], [], []>} : vector<8x32xbf16>, vector<32x128xbf16>, vector<8x128xf32> -> vector<8x128xf32>
    %155 = arith.addf %152, %154 : vector<8x128xf32>
    %156 = arith.negf %155 : vector<8x128xf32>
    %157 = math.exp %156 : vector<8x128xf32>
    %cst_53 = arith.constant 1.000000e+00 : f32
    %158 = vector.broadcast %cst_53 : f32 to vector<8x128xf32>
    %159 = arith.addf %158, %157 : vector<8x128xf32>
    %160 = arith.divf %158, %159 : vector<8x128xf32>
    %161 = math.tanh %155 : vector<8x128xf32>
    %162 = vector.extract_strided_slice %160 {offsets = [0, 0], sizes = [8, 32], strides = [1, 1]} : vector<8x128xf32> to vector<8x32xf32>
    %163 = vector.extract_strided_slice %160 {offsets = [0, 32], sizes = [8, 32], strides = [1, 1]} : vector<8x128xf32> to vector<8x32xf32>
    %164 = vector.extract_strided_slice %160 {offsets = [0, 96], sizes = [8, 32], strides = [1, 1]} : vector<8x128xf32> to vector<8x32xf32>
    %165 = vector.extract_strided_slice %161 {offsets = [0, 64], sizes = [8, 32], strides = [1, 1]} : vector<8x128xf32> to vector<8x32xf32>
    %166 = arith.mulf %163, %148 : vector<8x32xf32>
    %167 = arith.mulf %162, %165 : vector<8x32xf32>
    %168 = arith.addf %166, %167 : vector<8x32xf32>
    %169 = math.tanh %168 : vector<8x32xf32>
    %170 = arith.mulf %164, %169 : vector<8x32xf32>
    %c56_54 = arith.constant 56 : index
    %c0_55 = arith.constant 0 : index
    %171 = vector.load %arg13[%c56_54, %c0_55] : memref<64x32xf32, #tpu.memory_space<vmem>>, vector<8x32xf32>
    tpu.vector_store %arg13[%c56_54, %c0_55], %170 {strides = array<i32>} : memref<64x32xf32, #tpu.memory_space<vmem>>, vector<8x32xf32>,
    %c0_56 = arith.constant 0 : index
    %c0_57 = arith.constant 0 : index
    %172 = vector.load %arg13[%c0_56, %c0_57] : memref<64x32xf32, #tpu.memory_space<vmem>>, vector<64x32xf32>
    %173 = arith.truncf %172 : vector<64x32xf32> to vector<64x32xbf16>
    %c0_58 = arith.constant 0 : index
    %c0_59 = arith.constant 0 : index
    %c0_60 = arith.constant 0 : index
    %174 = vector.load %arg4[%c0_58, %c0_59, %c0_60] : memref<1x32x128xbf16, #tpu.memory_space<vmem>>, vector<1x32x128xbf16>
    %175 = vector.shape_cast %174 : vector<1x32x128xbf16> to vector<32x128xbf16>
    %cst_61 = arith.constant dense<0.000000e+00> : vector<64x128xf32>
    %176 = tpu.matmul %173, %175, %cst_61 {dimension_numbers = #tpu.dot_dimension_numbers<[1], [0], [0], [1], [0, 0, 1, 1], [], []>} : vector<64x32xbf16>, vector<32x128xbf16>, vector<64x128xf32> -> vector<64x128xf32>
    %c0_62 = arith.constant 0 : index
    %c0_63 = arith.constant 0 : index
    %c0_64 = arith.constant 0 : index
    %177 = vector.load %arg6[%c0_62, %c0_63, %c0_64] : memref<1x1x128xf32, #tpu.memory_space<vmem>>, vector<1x1x128xf32>
    %178 = vector.shape_cast %177 : vector<1x1x128xf32> to vector<1x128xf32>
    %179 = vector.broadcast %178 : vector<1x128xf32> to vector<64x128xf32>
    %180 = arith.addf %176, %179 : vector<64x128xf32>
    %c0_65 = arith.constant 0 : index
    %c0_66 = arith.constant 0 : index
    %181 = vector.load %arg12[%c0_65, %c0_66] : memref<64x128xf32, #tpu.memory_space<vmem>>, vector<64x128xf32>
    tpu.vector_store %arg12[%c0_65, %c0_66], %180 {strides = array<i32>} : memref<64x128xf32, #tpu.memory_space<vmem>>, vector<64x128xf32>,
    %c1 = arith.constant 1 : index
    %c0_67 = arith.constant 0 : index
    %c0_68 = arith.constant 0 : index
    %182 = vector.load %arg7[%c1, %c0_67, %c0_68] : memref<2x8x32xf32, #tpu.memory_space<vmem>>, vector<1x8x32xf32>
    %183 = vector.shape_cast %182 : vector<1x8x32xf32> to vector<8x32xf32>
    %c1_69 = arith.constant 1 : index
    %c0_70 = arith.constant 0 : index
    %c0_71 = arith.constant 0 : index
    %184 = vector.load %arg8[%c1_69, %c0_70, %c0_71] : memref<2x8x32xf32, #tpu.memory_space<vmem>>, vector<1x8x32xf32>
    %185 = vector.shape_cast %184 : vector<1x8x32xf32> to vector<8x32xf32>
    %c0_72 = arith.constant 0 : index
    %c0_73 = arith.constant 0 : index
    %c0_74 = arith.constant 0 : index
    %186 = vector.load %arg5[%c0_72, %c0_73, %c0_74] : memref<1x32x128xbf16, #tpu.memory_space<vmem>>, vector<1x32x128xbf16>
    %187 = vector.shape_cast %186 : vector<1x32x128xbf16> to vector<32x128xbf16>
    %c0_75 = arith.constant 0 : index
    %c0_76 = arith.constant 0 : index
    %188 = vector.load %arg12[%c0_75, %c0_76] : memref<64x128xf32, #tpu.memory_space<vmem>>, vector<8x128xf32>
    %189 = arith.truncf %183 : vector<8x32xf32> to vector<8x32xbf16>
    %cst_77 = arith.constant dense<0.000000e+00> : vector<8x128xf32>
    %190 = tpu.matmul %189, %187, %cst_77 {dimension_numbers = #tpu.dot_dimension_numbers<[1], [0], [0], [1], [0, 0, 1, 1], [], []>} : vector<8x32xbf16>, vector<32x128xbf16>, vector<8x128xf32> -> vector<8x128xf32>
    %191 = arith.addf %188, %190 : vector<8x128xf32>
    %192 = arith.negf %191 : vector<8x128xf32>
    %193 = math.exp %192 : vector<8x128xf32>
    %cst_78 = arith.constant 1.000000e+00 : f32
    %194 = vector.broadcast %cst_78 : f32 to vector<8x128xf32>
    %195 = arith.addf %194, %193 : vector<8x128xf32>
    %196 = arith.divf %194, %195 : vector<8x128xf32>
    %197 = math.tanh %191 : vector<8x128xf32>
    %198 = vector.extract_strided_slice %196 {offsets = [0, 0], sizes = [8, 32], strides = [1, 1]} : vector<8x128xf32> to vector<8x32xf32>
    %199 = vector.extract_strided_slice %196 {offsets = [0, 32], sizes = [8, 32], strides = [1, 1]} : vector<8x128xf32> to vector<8x32xf32>
    %200 = vector.extract_strided_slice %196 {offsets = [0, 96], sizes = [8, 32], strides = [1, 1]} : vector<8x128xf32> to vector<8x32xf32>
    %201 = vector.extract_strided_slice %197 {offsets = [0, 64], sizes = [8, 32], strides = [1, 1]} : vector<8x128xf32> to vector<8x32xf32>
    %202 = arith.mulf %199, %185 : vector<8x32xf32>
    %203 = arith.mulf %198, %201 : vector<8x32xf32>
    %204 = arith.addf %202, %203 : vector<8x32xf32>
    %205 = math.tanh %204 : vector<8x32xf32>
    %206 = arith.mulf %200, %205 : vector<8x32xf32>
    %c8_79 = arith.constant 8 : index
    %c0_80 = arith.constant 0 : index
    %207 = vector.load %arg12[%c8_79, %c0_80] : memref<64x128xf32, #tpu.memory_space<vmem>>, vector<8x128xf32>
    %208 = arith.truncf %206 : vector<8x32xf32> to vector<8x32xbf16>
    %cst_81 = arith.constant dense<0.000000e+00> : vector<8x128xf32>
    %209 = tpu.matmul %208, %187, %cst_81 {dimension_numbers = #tpu.dot_dimension_numbers<[1], [0], [0], [1], [0, 0, 1, 1], [], []>} : vector<8x32xbf16>, vector<32x128xbf16>, vector<8x128xf32> -> vector<8x128xf32>
    %210 = arith.addf %207, %209 : vector<8x128xf32>
    %211 = arith.negf %210 : vector<8x128xf32>
    %212 = math.exp %211 : vector<8x128xf32>
    %cst_82 = arith.constant 1.000000e+00 : f32
    %213 = vector.broadcast %cst_82 : f32 to vector<8x128xf32>
    %214 = arith.addf %213, %212 : vector<8x128xf32>
    %215 = arith.divf %213, %214 : vector<8x128xf32>
    %216 = math.tanh %210 : vector<8x128xf32>
    %217 = vector.extract_strided_slice %215 {offsets = [0, 0], sizes = [8, 32], strides = [1, 1]} : vector<8x128xf32> to vector<8x32xf32>
    %218 = vector.extract_strided_slice %215 {offsets = [0, 32], sizes = [8, 32], strides = [1, 1]} : vector<8x128xf32> to vector<8x32xf32>
    %219 = vector.extract_strided_slice %215 {offsets = [0, 96], sizes = [8, 32], strides = [1, 1]} : vector<8x128xf32> to vector<8x32xf32>
    %220 = vector.extract_strided_slice %216 {offsets = [0, 64], sizes = [8, 32], strides = [1, 1]} : vector<8x128xf32> to vector<8x32xf32>
    %221 = arith.mulf %218, %204 : vector<8x32xf32>
    %222 = arith.mulf %217, %220 : vector<8x32xf32>
    %223 = arith.addf %221, %222 : vector<8x32xf32>
    %224 = math.tanh %223 : vector<8x32xf32>
    %225 = arith.mulf %219, %224 : vector<8x32xf32>
    %c16_83 = arith.constant 16 : index
    %c0_84 = arith.constant 0 : index
    %226 = vector.load %arg12[%c16_83, %c0_84] : memref<64x128xf32, #tpu.memory_space<vmem>>, vector<8x128xf32>
    %227 = arith.truncf %225 : vector<8x32xf32> to vector<8x32xbf16>
    %cst_85 = arith.constant dense<0.000000e+00> : vector<8x128xf32>
    %228 = tpu.matmul %227, %187, %cst_85 {dimension_numbers = #tpu.dot_dimension_numbers<[1], [0], [0], [1], [0, 0, 1, 1], [], []>} : vector<8x32xbf16>, vector<32x128xbf16>, vector<8x128xf32> -> vector<8x128xf32>
    %229 = arith.addf %226, %228 : vector<8x128xf32>
    %230 = arith.negf %229 : vector<8x128xf32>
    %231 = math.exp %230 : vector<8x128xf32>
    %cst_86 = arith.constant 1.000000e+00 : f32
    %232 = vector.broadcast %cst_86 : f32 to vector<8x128xf32>
    %233 = arith.addf %232, %231 : vector<8x128xf32>
    %234 = arith.divf %232, %233 : vector<8x128xf32>
    %235 = math.tanh %229 : vector<8x128xf32>
    %236 = vector.extract_strided_slice %234 {offsets = [0, 0], sizes = [8, 32], strides = [1, 1]} : vector<8x128xf32> to vector<8x32xf32>
    %237 = vector.extract_strided_slice %234 {offsets = [0, 32], sizes = [8, 32], strides = [1, 1]} : vector<8x128xf32> to vector<8x32xf32>
    %238 = vector.extract_strided_slice %234 {offsets = [0, 96], sizes = [8, 32], strides = [1, 1]} : vector<8x128xf32> to vector<8x32xf32>
    %239 = vector.extract_strided_slice %235 {offsets = [0, 64], sizes = [8, 32], strides = [1, 1]} : vector<8x128xf32> to vector<8x32xf32>
    %240 = arith.mulf %237, %223 : vector<8x32xf32>
    %241 = arith.mulf %236, %239 : vector<8x32xf32>
    %242 = arith.addf %240, %241 : vector<8x32xf32>
    %243 = math.tanh %242 : vector<8x32xf32>
    %244 = arith.mulf %238, %243 : vector<8x32xf32>
    %c24_87 = arith.constant 24 : index
    %c0_88 = arith.constant 0 : index
    %245 = vector.load %arg12[%c24_87, %c0_88] : memref<64x128xf32, #tpu.memory_space<vmem>>, vector<8x128xf32>
    %246 = arith.truncf %244 : vector<8x32xf32> to vector<8x32xbf16>
    %cst_89 = arith.constant dense<0.000000e+00> : vector<8x128xf32>
    %247 = tpu.matmul %246, %187, %cst_89 {dimension_numbers = #tpu.dot_dimension_numbers<[1], [0], [0], [1], [0, 0, 1, 1], [], []>} : vector<8x32xbf16>, vector<32x128xbf16>, vector<8x128xf32> -> vector<8x128xf32>
    %248 = arith.addf %245, %247 : vector<8x128xf32>
    %249 = arith.negf %248 : vector<8x128xf32>
    %250 = math.exp %249 : vector<8x128xf32>
    %cst_90 = arith.constant 1.000000e+00 : f32
    %251 = vector.broadcast %cst_90 : f32 to vector<8x128xf32>
    %252 = arith.addf %251, %250 : vector<8x128xf32>
    %253 = arith.divf %251, %252 : vector<8x128xf32>
    %254 = math.tanh %248 : vector<8x128xf32>
    %255 = vector.extract_strided_slice %253 {offsets = [0, 0], sizes = [8, 32], strides = [1, 1]} : vector<8x128xf32> to vector<8x32xf32>
    %256 = vector.extract_strided_slice %253 {offsets = [0, 32], sizes = [8, 32], strides = [1, 1]} : vector<8x128xf32> to vector<8x32xf32>
    %257 = vector.extract_strided_slice %253 {offsets = [0, 96], sizes = [8, 32], strides = [1, 1]} : vector<8x128xf32> to vector<8x32xf32>
    %258 = vector.extract_strided_slice %254 {offsets = [0, 64], sizes = [8, 32], strides = [1, 1]} : vector<8x128xf32> to vector<8x32xf32>
    %259 = arith.mulf %256, %242 : vector<8x32xf32>
    %260 = arith.mulf %255, %258 : vector<8x32xf32>
    %261 = arith.addf %259, %260 : vector<8x32xf32>
    %262 = math.tanh %261 : vector<8x32xf32>
    %263 = arith.mulf %257, %262 : vector<8x32xf32>
    %c32_91 = arith.constant 32 : index
    %c0_92 = arith.constant 0 : index
    %264 = vector.load %arg12[%c32_91, %c0_92] : memref<64x128xf32, #tpu.memory_space<vmem>>, vector<8x128xf32>
    %265 = arith.truncf %263 : vector<8x32xf32> to vector<8x32xbf16>
    %cst_93 = arith.constant dense<0.000000e+00> : vector<8x128xf32>
    %266 = tpu.matmul %265, %187, %cst_93 {dimension_numbers = #tpu.dot_dimension_numbers<[1], [0], [0], [1], [0, 0, 1, 1], [], []>} : vector<8x32xbf16>, vector<32x128xbf16>, vector<8x128xf32> -> vector<8x128xf32>
    %267 = arith.addf %264, %266 : vector<8x128xf32>
    %268 = arith.negf %267 : vector<8x128xf32>
    %269 = math.exp %268 : vector<8x128xf32>
    %cst_94 = arith.constant 1.000000e+00 : f32
    %270 = vector.broadcast %cst_94 : f32 to vector<8x128xf32>
    %271 = arith.addf %270, %269 : vector<8x128xf32>
    %272 = arith.divf %270, %271 : vector<8x128xf32>
    %273 = math.tanh %267 : vector<8x128xf32>
    %274 = vector.extract_strided_slice %272 {offsets = [0, 0], sizes = [8, 32], strides = [1, 1]} : vector<8x128xf32> to vector<8x32xf32>
    %275 = vector.extract_strided_slice %272 {offsets = [0, 32], sizes = [8, 32], strides = [1, 1]} : vector<8x128xf32> to vector<8x32xf32>
    %276 = vector.extract_strided_slice %272 {offsets = [0, 96], sizes = [8, 32], strides = [1, 1]} : vector<8x128xf32> to vector<8x32xf32>
    %277 = vector.extract_strided_slice %273 {offsets = [0, 64], sizes = [8, 32], strides = [1, 1]} : vector<8x128xf32> to vector<8x32xf32>
    %278 = arith.mulf %275, %261 : vector<8x32xf32>
    %279 = arith.mulf %274, %277 : vector<8x32xf32>
    %280 = arith.addf %278, %279 : vector<8x32xf32>
    %281 = math.tanh %280 : vector<8x32xf32>
    %282 = arith.mulf %276, %281 : vector<8x32xf32>
    %c40_95 = arith.constant 40 : index
    %c0_96 = arith.constant 0 : index
    %283 = vector.load %arg12[%c40_95, %c0_96] : memref<64x128xf32, #tpu.memory_space<vmem>>, vector<8x128xf32>
    %284 = arith.truncf %282 : vector<8x32xf32> to vector<8x32xbf16>
    %cst_97 = arith.constant dense<0.000000e+00> : vector<8x128xf32>
    %285 = tpu.matmul %284, %187, %cst_97 {dimension_numbers = #tpu.dot_dimension_numbers<[1], [0], [0], [1], [0, 0, 1, 1], [], []>} : vector<8x32xbf16>, vector<32x128xbf16>, vector<8x128xf32> -> vector<8x128xf32>
    %286 = arith.addf %283, %285 : vector<8x128xf32>
    %287 = arith.negf %286 : vector<8x128xf32>
    %288 = math.exp %287 : vector<8x128xf32>
    %cst_98 = arith.constant 1.000000e+00 : f32
    %289 = vector.broadcast %cst_98 : f32 to vector<8x128xf32>
    %290 = arith.addf %289, %288 : vector<8x128xf32>
    %291 = arith.divf %289, %290 : vector<8x128xf32>
    %292 = math.tanh %286 : vector<8x128xf32>
    %293 = vector.extract_strided_slice %291 {offsets = [0, 0], sizes = [8, 32], strides = [1, 1]} : vector<8x128xf32> to vector<8x32xf32>
    %294 = vector.extract_strided_slice %291 {offsets = [0, 32], sizes = [8, 32], strides = [1, 1]} : vector<8x128xf32> to vector<8x32xf32>
    %295 = vector.extract_strided_slice %291 {offsets = [0, 96], sizes = [8, 32], strides = [1, 1]} : vector<8x128xf32> to vector<8x32xf32>
    %296 = vector.extract_strided_slice %292 {offsets = [0, 64], sizes = [8, 32], strides = [1, 1]} : vector<8x128xf32> to vector<8x32xf32>
    %297 = arith.mulf %294, %280 : vector<8x32xf32>
    %298 = arith.mulf %293, %296 : vector<8x32xf32>
    %299 = arith.addf %297, %298 : vector<8x32xf32>
    %300 = math.tanh %299 : vector<8x32xf32>
    %301 = arith.mulf %295, %300 : vector<8x32xf32>
    %c48_99 = arith.constant 48 : index
    %c0_100 = arith.constant 0 : index
    %302 = vector.load %arg12[%c48_99, %c0_100] : memref<64x128xf32, #tpu.memory_space<vmem>>, vector<8x128xf32>
    %303 = arith.truncf %301 : vector<8x32xf32> to vector<8x32xbf16>
    %cst_101 = arith.constant dense<0.000000e+00> : vector<8x128xf32>
    %304 = tpu.matmul %303, %187, %cst_101 {dimension_numbers = #tpu.dot_dimension_numbers<[1], [0], [0], [1], [0, 0, 1, 1], [], []>} : vector<8x32xbf16>, vector<32x128xbf16>, vector<8x128xf32> -> vector<8x128xf32>
    %305 = arith.addf %302, %304 : vector<8x128xf32>
    %306 = arith.negf %305 : vector<8x128xf32>
    %307 = math.exp %306 : vector<8x128xf32>
    %cst_102 = arith.constant 1.000000e+00 : f32
    %308 = vector.broadcast %cst_102 : f32 to vector<8x128xf32>
    %309 = arith.addf %308, %307 : vector<8x128xf32>
    %310 = arith.divf %308, %309 : vector<8x128xf32>
    %311 = math.tanh %305 : vector<8x128xf32>
    %312 = vector.extract_strided_slice %310 {offsets = [0, 0], sizes = [8, 32], strides = [1, 1]} : vector<8x128xf32> to vector<8x32xf32>
    %313 = vector.extract_strided_slice %310 {offsets = [0, 32], sizes = [8, 32], strides = [1, 1]} : vector<8x128xf32> to vector<8x32xf32>
    %314 = vector.extract_strided_slice %310 {offsets = [0, 96], sizes = [8, 32], strides = [1, 1]} : vector<8x128xf32> to vector<8x32xf32>
    %315 = vector.extract_strided_slice %311 {offsets = [0, 64], sizes = [8, 32], strides = [1, 1]} : vector<8x128xf32> to vector<8x32xf32>
    %316 = arith.mulf %313, %299 : vector<8x32xf32>
    %317 = arith.mulf %312, %315 : vector<8x32xf32>
    %318 = arith.addf %316, %317 : vector<8x32xf32>
    %319 = math.tanh %318 : vector<8x32xf32>
    %320 = arith.mulf %314, %319 : vector<8x32xf32>
    %c56_103 = arith.constant 56 : index
    %c0_104 = arith.constant 0 : index
    %321 = vector.load %arg12[%c56_103, %c0_104] : memref<64x128xf32, #tpu.memory_space<vmem>>, vector<8x128xf32>
    %322 = arith.truncf %320 : vector<8x32xf32> to vector<8x32xbf16>
    %cst_105 = arith.constant dense<0.000000e+00> : vector<8x128xf32>
    %323 = tpu.matmul %322, %187, %cst_105 {dimension_numbers = #tpu.dot_dimension_numbers<[1], [0], [0], [1], [0, 0, 1, 1], [], []>} : vector<8x32xbf16>, vector<32x128xbf16>, vector<8x128xf32> -> vector<8x128xf32>
    %324 = arith.addf %321, %323 : vector<8x128xf32>
    %325 = arith.negf %324 : vector<8x128xf32>
    %326 = math.exp %325 : vector<8x128xf32>
    %cst_106 = arith.constant 1.000000e+00 : f32
    %327 = vector.broadcast %cst_106 : f32 to vector<8x128xf32>
    %328 = arith.addf %327, %326 : vector<8x128xf32>
    %329 = arith.divf %327, %328 : vector<8x128xf32>
    %330 = math.tanh %324 : vector<8x128xf32>
    %331 = vector.extract_strided_slice %329 {offsets = [0, 0], sizes = [8, 32], strides = [1, 1]} : vector<8x128xf32> to vector<8x32xf32>
    %332 = vector.extract_strided_slice %329 {offsets = [0, 32], sizes = [8, 32], strides = [1, 1]} : vector<8x128xf32> to vector<8x32xf32>
    %333 = vector.extract_strided_slice %329 {offsets = [0, 96], sizes = [8, 32], strides = [1, 1]} : vector<8x128xf32> to vector<8x32xf32>
    %334 = vector.extract_strided_slice %330 {offsets = [0, 64], sizes = [8, 32], strides = [1, 1]} : vector<8x128xf32> to vector<8x32xf32>
    %335 = arith.mulf %332, %318 : vector<8x32xf32>
    %336 = arith.mulf %331, %334 : vector<8x32xf32>
    %337 = arith.addf %335, %336 : vector<8x32xf32>
    %338 = math.tanh %337 : vector<8x32xf32>
    %339 = arith.mulf %333, %338 : vector<8x32xf32>
    %340 = arith.truncf %339 : vector<8x32xf32> to vector<8x32xbf16>
    %c0_107 = arith.constant 0 : index
    %c0_108 = arith.constant 0 : index
    %341 = vector.load %arg9[%c0_107, %c0_108] : memref<32x128xbf16, #tpu.memory_space<vmem>>, vector<32x128xbf16>
    %cst_109 = arith.constant dense<0.000000e+00> : vector<8x128xf32>
    %342 = tpu.matmul %340, %341, %cst_109 {dimension_numbers = #tpu.dot_dimension_numbers<[1], [0], [0], [1], [0, 0, 1, 1], [], []>} : vector<8x32xbf16>, vector<32x128xbf16>, vector<8x128xf32> -> vector<8x128xf32>
    %c0_110 = arith.constant 0 : index
    %c0_111 = arith.constant 0 : index
    %343 = vector.load %arg10[%c0_110, %c0_111] : memref<1x128xf32, #tpu.memory_space<vmem>>, vector<1x128xf32>
    %344 = vector.broadcast %343 : vector<1x128xf32> to vector<8x128xf32>
    %345 = arith.addf %342, %344 : vector<8x128xf32>
    %c0_112 = arith.constant 0 : index
    %c0_113 = arith.constant 0 : index
    %346 = vector.load %arg11[%c0_112, %c0_113] : memref<8x128xf32, #tpu.memory_space<vmem>>, vector<8x128xf32>
    tpu.vector_store %arg11[%c0_112, %c0_113], %345 {strides = array<i32>} : memref<8x128xf32, #tpu.memory_space<vmem>>, vector<8x128xf32>,
    return
  }
}

</mosaic_0001>

<bundles_post_ra>
// kernel: lstm_model_forward.1
= control target key start
LH: loop header
LB: loop body
LE: loop exit
PB: predicated region body
PF: predicated region fallthrough
CT: control target
= control target key end

     0   :  { %vm79_vm0 = vcmask 130048   ;;  %vm149_vm1 = vcmask 261120   ;;  %s1522_s27 = smov 64   ;;  %s1523_s30 = smov 32   ;;  %s1868_s1 = inlined_call_operand.vmem [shape: bf16[16,128], index: 1, kind: input, shape index: {}]   ;;  %s1869_s2 = inlined_call_operand.vmem [shape: bf16[32,128], index: 2, kind: input, shape index: {}]   ;;  %s1870_s0 = inlined_call_operand.vmem [shape: bf16[64,16], index: 0, kind: input, shape index: {}]   ;;  %s1871_s7 = inlined_call_operand.vmem [shape: f32[2,8,32], index: 7, kind: input, shape index: {}]   ;;  %s1872_s3 = inlined_call_operand.vmem [shape: f32[1,128], index: 3, kind: input, shape index: {}]   ;;  %s1873_s8 = inlined_call_operand.vmem [shape: f32[2,8,32], index: 8, kind: input, shape index: {}]   ;;  %s1874_s4 = inlined_call_operand.vmem [shape: bf16[1,32,128], index: 4, kind: input, shape index: {}]   ;;  %s1875_s6 = inlined_call_operand.vmem [shape: f32[1,1,128], index: 6, kind: input, shape index: {}]   ;;  %s1876_s5 = inlined_call_operand.vmem [shape: bf16[1,32,128], index: 5, kind: input, shape index: {}]   ;;  %s1877_s9 = inlined_call_operand.vmem [shape: bf16[32,128], index: 9, kind: input, shape index: {}]   ;;  %s1878_s10 = inlined_call_operand.vmem [shape: f32[1,128], index: 10, kind: input, shape index: {}]   ;;  %s1879_s11 = inlined_call_operand.vmem [shape: f32[8,128], index: 11, kind: output, shape index: {}]  }
   0x1   :  { %v1379_v0 = vld [vmem:[%s1868_s1] sm:$0xff]  ;;  %v1590_v1 = vld [vmem:[%s1869_s2 + $0x8] sm:$0xff] }
   0x2   :  { %v1375_v2 = vld [vmem:[%s1870_s0] sm:$0xff]  ;;  %99 = vmatpush.bf16.msra.mxu0 %v1379_v0  ;;  %159 = vmatpush.bf16.msra.mxu1 %v1590_v1  ;;  %v1376_v63 = vld [vmem:[%s1870_s0 + $0x8] sm:$0xff] }
   0x3   :  { %v1599_v3 = vld [vmem:[%s1869_s2] sm:$0xff]  ;;  %227 = vmatpush.bf16.msra.mxu2 %v1590_v1  ;;  %291 = vmatpush.bf16.msra.mxu3 %v1590_v1 }
   0x4   :  { %v129_v4 = vld [vmem:[%s1871_s7] sm:$0xff] }
   0x5   :  { %1300 = vmatmul.msk.bf16.vlgmr.msra.gmra.mxu0 %vm79_vm0, %v1375_v2  ;;  %v136_v5 = vpack.c.bf16 %v129_v4, %v129_v4  ;;  %v1622_v6 = vld [vmem:[%s1872_s3] ss:$0 sm:$0xff] }
   0x6   :  { %160 = vmatpush.bf16.msra.mxu1 %v1599_v3  ;;  %v130_v13 = vld [vmem:[%s1873_s8] sm:$0xff] }
   0x7   :  { %228 = vmatpush.bf16.msra.mxu2 %v1599_v3  ;;  %292 = vmatpush.bf16.msra.mxu3 %v1599_v3 }
   0x9   :  { %1312 = vmatmul.msk.bf16.vlgmr.msra.gmra.mxu1 %vm149_vm1, %v136_v5 }
   0xa   :  { %355 = vmatpush.bf16.msrb.mxu1 %v1590_v1 }
   0xb   :  { %419 = vmatpush.bf16.msrb.mxu2 %v1590_v1  ;;  %483 = vmatpush.bf16.msrb.mxu3 %v1590_v1 }
   0xe   :  { %356 = vmatpush.bf16.msrb.mxu1 %v1599_v3 }
   0xf   :  { %420 = vmatpush.bf16.msrb.mxu2 %v1599_v3  ;;  %484 = vmatpush.bf16.msrb.mxu3 %v1599_v3 }
  0x12   :  { %547 = vmatpush.bf16.msra.mxu1 %v1590_v1 }
  0x15   :  { %1301 = vmatmul.msk.bf16.gmra.mxu0 %vm79_vm0, %v1376_v63 }
  0x16   :  { %548 = vmatpush.bf16.msra.mxu1 %v1599_v3 }
  0x82   :  { %v101_v7 = vpop.f32.mrf.mxu0 }
  0x83   :  { %v102_v8 = vadd.f32 %v1622_v6, %v101_v7 }
  0x86   :  { %v162_v9 = vpop.f32.mrf.mxu1 }
  0x87   :  { %v166_v10 = vadd.f32 %v162_v9, %v102_v8 }
  0x89   :  { %1393 = vtanh.f32 %v166_v10  ;;  %v1313_v14 = vmul.f32 -1.442695, %v166_v10 }
  0x8a   :  { %v103_v38 = vpop.f32.mrf.mxu0 }
  0x8b   :  { %1395 = vpow2.f32 %v1313_v14  ;;  %v104_v39 = vadd.f32 %v1622_v6, %v103_v38 }
  0x8e   :  { %v164_v11 = vpop.f32.mrf.mxu1 }
  0x8f   :  { %v1394_v12 = vpop.eup %1393 }
  0x90   :  { %193 = vrot.lane.b32.xlu0 %v1394_v12, %s1522_s27 }
  0x91   :  { %v1396_v15 = vpop.eup %1395 }
  0x92   :  { %v170_v16 = vadd.f32 1.0, %v1396_v15  ;;  %v106_v4 = vpop.f32.mrf.mxu0 }
  0x93   :  { %v107_v5 = vadd.f32 %v1622_v6, %v106_v4 }
  0x94   :  { %1397 = vrcp.f32 %v170_v16  ;;  %v182_v22 = vand.u32 2147483648, %v170_v16  ;;  %vm176_vm3 = vweird.f32 %v170_v16  ;;  %v180_v23 = vand.u32 2147483647, %v170_v16 }
  0x96   :  { %v183_v25 = vor.u32 1.1754944e-38, %v182_v22  ;;  %vm181_vm5 = vcmp.eq.f32.partialorder %v180_v23, 8.507059e+37 }
  0x98   :  { %188 = vrot.lane.b32.xlu0 %v130_v13, %s1523_s30 }
  0x9a   :  { %v1398_v17 = vpop.eup %1397 }
  0x9b   :  { %v172_v18 = vmul.f32 %v1398_v17, %v170_v16  ;;  %vm177_vm2 = vweird.f32 %v1398_v17 }
  0x9c   :  { %vm178_vm4 = vmor %vm176_vm3, %vm177_vm2 }
  0x9d   :  { %v173_v19 = vsub.f32 1.0, %v172_v18 }
  0x9f   :  { %v174_v20 = vmul.f32 %v1398_v17, %v173_v19 }
  0xa1   :  { %v175_v21 = vadd.f32 %v1398_v17, %v174_v20 }
  0xa3   :  { %v179_v24 = vsel %vm178_vm4, %v1398_v17, %v175_v21 }
  0xa4   :  { %v184_v27 = vsel %vm181_vm5, %v183_v25, %v179_v24 }
 0x102   :  { %v194_v26 = vpop.permute.xlu0 %193 }
 0x103   :  { %v196_v28 = vmul.f32 %v194_v26, %v184_v27 }
 0x105   :  { %198 = vrot.lane.b32.xlu1 %v196_v28, %s1523_s30 }
 0x10a   :  { %v189_v29 = vpop.permute.xlu0 %188 }
 0x10b   :  { %v191_v30 = vmul.f32 %v189_v29, %v184_v27 }
 0x177   :  { %v199_v31 = vpop.permute.xlu1 %198 }
 0x178   :  { %v201_v32 = vadd.f32 %v199_v31, %v191_v30 }
 0x17a   :  { %1399 = vtanh.f32 %v201_v32 }
 0x180   :  { %v1400_v33 = vpop.eup %1399 }
 0x181   :  { %204 = vrot.lane.b32.xlu1 %v1400_v33, %s1522_s27 }
 0x1f3   :  { %v205_v34 = vpop.permute.xlu1 %204 }
 0x1f4   :  { %v1632_v35 = vmul.f32 %v205_v34, %v184_v27  ;;  %v108_v34 = vpop.f32.mrf.mxu0 }
 0x1f6   :  { %v214_v36 = vpack.c.bf16 %v1632_v35, %v1632_v35 }
 0x1f8   :  { %216 = vrot.lane.b32.xlu2 %v214_v36, %s1523_s30  ;;  %v109_v36 = vadd.f32 %v1622_v6, %v108_v34 }
 0x252   :  { %v217_v37 = vpop.permute.xlu2 %216 }
 0x253   :  { %1314 = vmatmul.msk.bf16.vlgmr.msra.gmra.mxu2 %vm149_vm1, %v217_v37 }
 0x254   :  { %611 = vmatpush.bf16.msra.mxu2 %v1590_v1 }
 0x258   :  { %612 = vmatpush.bf16.msra.mxu2 %v1599_v3 }
 0x2d6   :  { %v230_v40 = vpop.f32.mrf.mxu2 }
 0x2d7   :  { %v234_v41 = vadd.f32 %v230_v40, %v104_v39 }
 0x2d9   :  { %1401 = vtanh.f32 %v234_v41  ;;  %v1315_v44 = vmul.f32 -1.442695, %v234_v41 }
 0x2db   :  { %1403 = vpow2.f32 %v1315_v44 }
 0x2de   :  { %v232_v42 = vpop.f32.mrf.mxu2 }
 0x2df   :  { %v1402_v43 = vpop.eup %1401 }
 0x2e0   :  { %257 = vrot.lane.b32.xlu2 %v1402_v43, %s1522_s27 }
 0x2e1   :  { %v1404_v45 = vpop.eup %1403 }
 0x2e2   :  { %v238_v46 = vadd.f32 1.0, %v1404_v45 }
 0x2e4   :  { %1405 = vrcp.f32 %v238_v46  ;;  %v250_v52 = vand.u32 2147483648, %v238_v46  ;;  %vm244_vm7 = vweird.f32 %v238_v46  ;;  %v248_v53 = vand.u32 2147483647, %v238_v46 }
 0x2e6   :  { %v251_v55 = vor.u32 1.1754944e-38, %v250_v52  ;;  %vm249_vm9 = vcmp.eq.f32.partialorder %v248_v53, 8.507059e+37 }
 0x2ea   :  { %v1406_v47 = vpop.eup %1405 }
 0x2eb   :  { %v240_v48 = vmul.f32 %v1406_v47, %v238_v46  ;;  %vm245_vm6 = vweird.f32 %v1406_v47 }
 0x2ec   :  { %vm246_vm8 = vmor %vm244_vm7, %vm245_vm6 }
 0x2ed   :  { %v241_v49 = vsub.f32 1.0, %v240_v48 }
 0x2ef   :  { %v242_v50 = vmul.f32 %v1406_v47, %v241_v49 }
 0x2f1   :  { %v243_v51 = vadd.f32 %v1406_v47, %v242_v50 }
 0x2f3   :  { %v247_v54 = vsel %vm246_vm8, %v1406_v47, %v243_v51 }
 0x2f4   :  { %v252_v57 = vsel %vm249_vm9, %v251_v55, %v247_v54 }
 0x2f5   :  { %v255_v59 = vmul.f32 %v252_v57, %v201_v32 }
 0x33a   :  { %v258_v56 = vpop.permute.xlu2 %257 }
 0x33b   :  { %v260_v58 = vmul.f32 %v258_v56, %v252_v57 }
 0x33d   :  { %262 = vrot.lane.b32.xlu0 %v260_v58, %s1523_s30 }
 0x3af   :  { %v263_v60 = vpop.permute.xlu0 %262 }
 0x3b0   :  { %v265_v61 = vadd.f32 %v263_v60, %v255_v59  ;;  %v1377_v60 = vld [vmem:[%s1870_s0 + $0x10] sm:$0xff] }
 0x3b1   :  { %1302 = vmatmul.msk.bf16.gmra.mxu0 %vm79_vm0, %v1377_v60 }
 0x3b2   :  { %1407 = vtanh.f32 %v265_v61 }
 0x3b8   :  { %v1408_v62 = vpop.eup %1407 }
 0x3b9   :  { %268 = vrot.lane.b32.xlu1 %v1408_v62, %s1522_s27 }
 0x42b   :  { %v269_v0 = vpop.permute.xlu1 %268 }
 0x42c   :  { %v1648_v1 = vmul.f32 %v269_v0, %v252_v57 }
 0x42e   :  { %v278_v2 = vpack.c.bf16 %v1648_v1, %v1648_v1 }
 0x430   :  { %280 = vrot.lane.b32.xlu2 %v278_v2, %s1523_s30  ;;  %v111_v2 = vpop.f32.mrf.mxu0 }
 0x48a   :  { %v281_v3 = vpop.permute.xlu2 %280 }
 0x48b   :  { %1316 = vmatmul.msk.bf16.vlgmr.msra.gmra.mxu3 %vm149_vm1, %v281_v3  ;;  %v112_v3 = vadd.f32 %v1622_v6, %v111_v2 }
 0x50e   :  { %v294_v7 = vpop.f32.mrf.mxu3 }
 0x50f   :  { %v298_v8 = vadd.f32 %v294_v7, %v107_v5 }
 0x511   :  { %1409 = vtanh.f32 %v298_v8  ;;  %v1317_v11 = vmul.f32 -1.442695, %v298_v8 }
 0x513   :  { %1411 = vpow2.f32 %v1317_v11 }
 0x516   :  { %v296_v9 = vpop.f32.mrf.mxu3 }
 0x517   :  { %v1410_v10 = vpop.eup %1409 }
 0x518   :  { %321 = vrot.lane.b32.xlu0 %v1410_v10, %s1522_s27 }
 0x519   :  { %v1412_v12 = vpop.eup %1411 }
 0x51a   :  { %v302_v13 = vadd.f32 1.0, %v1412_v12 }
 0x51c   :  { %1413 = vrcp.f32 %v302_v13  ;;  %v314_v19 = vand.u32 2147483648, %v302_v13  ;;  %vm308_vm11 = vweird.f32 %v302_v13  ;;  %v312_v20 = vand.u32 2147483647, %v302_v13 }
 0x51e   :  { %v315_v22 = vor.u32 1.1754944e-38, %v314_v19  ;;  %vm313_vm13 = vcmp.eq.f32.partialorder %v312_v20, 8.507059e+37 }
 0x522   :  { %v1414_v14 = vpop.eup %1413 }
 0x523   :  { %v304_v15 = vmul.f32 %v1414_v14, %v302_v13  ;;  %vm309_vm10 = vweird.f32 %v1414_v14 }
 0x524   :  { %vm310_vm12 = vmor %vm308_vm11, %vm309_vm10 }
 0x525   :  { %v305_v16 = vsub.f32 1.0, %v304_v15 }
 0x527   :  { %v306_v17 = vmul.f32 %v1414_v14, %v305_v16 }
 0x529   :  { %v307_v18 = vadd.f32 %v1414_v14, %v306_v17 }
 0x52b   :  { %v311_v21 = vsel %vm310_vm12, %v1414_v14, %v307_v18 }
 0x52c   :  { %v316_v24 = vsel %vm313_vm13, %v315_v22, %v311_v21 }
 0x52d   :  { %v319_v26 = vmul.f32 %v316_v24, %v265_v61 }
 0x58a   :  { %v322_v23 = vpop.permute.xlu0 %321 }
 0x58b   :  { %v324_v25 = vmul.f32 %v322_v23, %v316_v24 }
 0x58d   :  { %326 = vrot.lane.b32.xlu1 %v324_v25, %s1523_s30 }
 0x5ff   :  { %v327_v27 = vpop.permute.xlu1 %326 }
 0x600   :  { %v329_v28 = vadd.f32 %v327_v27, %v319_v26 }
 0x602   :  { %1415 = vtanh.f32 %v329_v28 }
 0x608   :  { %v1416_v29 = vpop.eup %1415 }
 0x609   :  { %332 = vrot.lane.b32.xlu2 %v1416_v29, %s1522_s27 }
 0x663   :  { %v333_v30 = vpop.permute.xlu2 %332 }
 0x664   :  { %v1658_v31 = vmul.f32 %v333_v30, %v316_v24 }
 0x666   :  { %v342_v32 = vpack.c.bf16 %v1658_v31, %v1658_v31 }
 0x668   :  { %344 = vrot.lane.b32.xlu0 %v342_v32, %s1523_s30 }
 0x6da   :  { %v345_v33 = vpop.permute.xlu0 %344 }
 0x6db   :  { %1318 = vmatmul.msk.bf16.vlgmr.msrb.gmra.mxu1 %vm149_vm1, %v345_v33  ;;  %v113_v33 = vpop.f32.mrf.mxu0 }
 0x6dc   :  { %v114_v34 = vadd.f32 %v1622_v6, %v113_v33 }
 0x758   :  { %v358_v37 = vpop.f32.mrf.mxu1 }
 0x759   :  { %v362_v38 = vadd.f32 %v358_v37, %v109_v36 }
 0x75b   :  { %1417 = vtanh.f32 %v362_v38  ;;  %v1319_v41 = vmul.f32 -1.442695, %v362_v38 }
 0x75d   :  { %1419 = vpow2.f32 %v1319_v41 }
 0x760   :  { %v360_v39 = vpop.f32.mrf.mxu1 }
 0x761   :  { %v1418_v40 = vpop.eup %1417 }
 0x762   :  { %385 = vrot.lane.b32.xlu1 %v1418_v40, %s1522_s27 }
 0x763   :  { %v1420_v42 = vpop.eup %1419 }
 0x764   :  { %v366_v43 = vadd.f32 1.0, %v1420_v42 }
 0x766   :  { %1421 = vrcp.f32 %v366_v43  ;;  %v378_v49 = vand.u32 2147483648, %v366_v43  ;;  %vm372_vm15 = vweird.f32 %v366_v43  ;;  %v376_v50 = vand.u32 2147483647, %v366_v43 }
 0x768   :  { %v379_v52 = vor.u32 1.1754944e-38, %v378_v49  ;;  %vm377_vm3 = vcmp.eq.f32.partialorder %v376_v50, 8.507059e+37 }
 0x76c   :  { %v1422_v44 = vpop.eup %1421 }
 0x76d   :  { %v368_v45 = vmul.f32 %v1422_v44, %v366_v43  ;;  %vm373_vm14 = vweird.f32 %v1422_v44 }
 0x76e   :  { %vm374_vm2 = vmor %vm372_vm15, %vm373_vm14 }
 0x76f   :  { %v369_v46 = vsub.f32 1.0, %v368_v45 }
 0x771   :  { %v370_v47 = vmul.f32 %v1422_v44, %v369_v46 }
 0x773   :  { %v371_v48 = vadd.f32 %v1422_v44, %v370_v47 }
 0x775   :  { %v375_v51 = vsel %vm374_vm2, %v1422_v44, %v371_v48 }
 0x776   :  { %v380_v54 = vsel %vm377_vm3, %v379_v52, %v375_v51 }
 0x777   :  { %v383_v56 = vmul.f32 %v380_v54, %v329_v28 }
 0x7d4   :  { %v386_v53 = vpop.permute.xlu1 %385 }
 0x7d5   :  { %v388_v55 = vmul.f32 %v386_v53, %v380_v54 }
 0x7d7   :  { %390 = vrot.lane.b32.xlu2 %v388_v55, %s1523_s30  ;;  %v1383_v55 = vld [vmem:[%s1874_s4 + $0x8] sm:$0xff] }
 0x7d8   :  { %711 = vmatpush.bf16.msra.mxu3 %v1383_v55 }
 0x831   :  { %v391_v57 = vpop.permute.xlu2 %390 }
 0x832   :  { %v393_v58 = vadd.f32 %v391_v57, %v383_v56  ;;  %v1382_v56 = vld [vmem:[%s1874_s4] sm:$0xff] }
 0x833   :  { %712 = vmatpush.bf16.msra.mxu3 %v1382_v56 }
 0x834   :  { %1423 = vtanh.f32 %v393_v58 }
 0x83a   :  { %v1424_v59 = vpop.eup %1423 }
 0x83b   :  { %396 = vrot.lane.b32.xlu0 %v1424_v59, %s1522_s27 }
 0x8ad   :  { %v397_v61 = vpop.permute.xlu0 %396 }
 0x8ae   :  { %v1672_v62 = vmul.f32 %v397_v61, %v380_v54 }
 0x8b0   :  { %v406_v63 = vpack.c.bf16 %v1672_v62, %v1672_v62 }
 0x8b2   :  { %408 = vrot.lane.b32.xlu1 %v406_v63, %s1523_s30 }
 0x924   :  { %v409_v0 = vpop.permute.xlu1 %408 }
 0x925   :  { %1320 = vmatmul.msk.bf16.vlgmr.msrb.gmra.mxu2 %vm149_vm1, %v409_v0 }
 0x9a8   :  { %v422_v4 = vpop.f32.mrf.mxu2 }
 0x9a9   :  { %v426_v5 = vadd.f32 %v422_v4, %v112_v3 }
 0x9ab   :  { %1425 = vtanh.f32 %v426_v5  ;;  %v1321_v9 = vmul.f32 -1.442695, %v426_v5  ;;  %v1378_v5 = vld [vmem:[%s1870_s0 + $0x18] sm:$0xff] }
 0x9ac   :  { %1303 = vmatmul.msk.bf16.gmra.mxu0 %vm79_vm0, %v1378_v5 }
 0x9ad   :  { %1427 = vpow2.f32 %v1321_v9 }
 0x9b0   :  { %v424_v7 = vpop.f32.mrf.mxu2 }
 0x9b1   :  { %v1426_v8 = vpop.eup %1425  ;;  %v1720_v7 = vld [vmem:[%s1876_s5 + $0x8] sm:$0xff] }
 0x9b2   :  { %449 = vrot.lane.b32.xlu2 %v1426_v8, %s1522_s27  ;;  %773 = vmatpush.bf16.msrb.mxu1 %v1720_v7  ;;  %v1726_v8 = vld [vmem:[%s1876_s5] sm:$0xff] }
 0x9b3   :  { %v1428_v10 = vpop.eup %1427  ;;  %836 = vmatpush.bf16.msrb.mxu2 %v1720_v7  ;;  %895 = vmatpush.bf16.msrb.mxu0 %v1720_v7 }
 0x9b4   :  { %v430_v11 = vadd.f32 1.0, %v1428_v10  ;;  %v1340_v10 = vld [vmem:[%s1871_s7 + $0x8] sm:$0xff] }
 0x9b6   :  { %1429 = vrcp.f32 %v430_v11  ;;  %v442_v17 = vand.u32 2147483648, %v430_v11  ;;  %vm436_vm5 = vweird.f32 %v430_v11  ;;  %v440_v18 = vand.u32 2147483647, %v430_v11  ;;  %774 = vmatpush.bf16.msrb.mxu1 %v1726_v8 }
 0x9b7   :  { %837 = vmatpush.bf16.msrb.mxu2 %v1726_v8  ;;  %896 = vmatpush.bf16.msrb.mxu0 %v1726_v8 }
 0x9b8   :  { %v443_v20 = vor.u32 1.1754944e-38, %v442_v17  ;;  %vm441_vm7 = vcmp.eq.f32.partialorder %v440_v18, 8.507059e+37  ;;  %v1749_v18 = vld [vmem:[%s1875_s6] ss:$0 sm:$0xff] }
 0x9bb   :  { %1072 = vmatpush.bf16.msra.mxu0 %v1720_v7 }
 0x9bc   :  { %v1430_v12 = vpop.eup %1429 }
 0x9bd   :  { %v432_v13 = vmul.f32 %v1430_v12, %v430_v11  ;;  %vm437_vm4 = vweird.f32 %v1430_v12  ;;  %v751_v11 = vpack.c.bf16 %v1340_v10, %v1340_v10 }
 0x9be   :  { %vm438_vm6 = vmor %vm436_vm5, %vm437_vm4 }
 0x9bf   :  { %v433_v14 = vsub.f32 1.0, %v432_v13  ;;  %1073 = vmatpush.bf16.msra.mxu0 %v1726_v8 }
 0x9c1   :  { %v434_v15 = vmul.f32 %v1430_v12, %v433_v14 }
 0x9c3   :  { %v435_v16 = vadd.f32 %v1430_v12, %v434_v15 }
 0x9c5   :  { %v439_v19 = vsel %vm438_vm6, %v1430_v12, %v435_v16 }
 0x9c6   :  { %v444_v22 = vsel %vm441_vm7, %v443_v20, %v439_v19 }
 0x9c7   :  { %v447_v24 = vmul.f32 %v444_v22, %v393_v58 }
 0xa0c   :  { %v450_v21 = vpop.permute.xlu2 %449 }
 0xa0d   :  { %v452_v23 = vmul.f32 %v450_v21, %v444_v22  ;;  %v1341_v21 = vld [vmem:[%s1873_s8 + $0x8] sm:$0xff] }
 0xa0f   :  { %454 = vrot.lane.b32.xlu0 %v452_v23, %s1523_s30 }
 0xa29   :  { %v116_v12 = vpop.f32.mrf.mxu0 }
 0xa2a   :  { %v117_v13 = vadd.f32 %v1622_v6, %v116_v12 }
 0xa81   :  { %v455_v25 = vpop.permute.xlu0 %454 }
 0xa82   :  { %v457_v26 = vadd.f32 %v455_v25, %v447_v24 }
 0xa84   :  { %1431 = vtanh.f32 %v457_v26 }
 0xa8a   :  { %v1432_v27 = vpop.eup %1431 }
 0xa8b   :  { %460 = vrot.lane.b32.xlu1 %v1432_v27, %s1522_s27 }
 0xafd   :  { %v461_v28 = vpop.permute.xlu1 %460 }
 0xafe   :  { %v1682_v29 = vmul.f32 %v461_v28, %v444_v22 }
 0xb00   :  { %v470_v30 = vpack.c.bf16 %v1682_v29, %v1682_v29 }
 0xb02   :  { %472 = vrot.lane.b32.xlu2 %v470_v30, %s1523_s30 }
 0xb5c   :  { %v473_v32 = vpop.permute.xlu2 %472 }
 0xb5d   :  { %1322 = vmatmul.msk.bf16.vlgmr.msrb.gmra.mxu3 %vm149_vm1, %v473_v32 }
 0xbe0   :  { %v486_v36 = vpop.f32.mrf.mxu3 }
 0xbe1   :  { %v490_v37 = vadd.f32 %v486_v36, %v114_v34 }
 0xbe3   :  { %1433 = vtanh.f32 %v490_v37  ;;  %v1323_v40 = vmul.f32 -1.442695, %v490_v37 }
 0xbe5   :  { %1435 = vpow2.f32 %v1323_v40 }
 0xbe8   :  { %v488_v38 = vpop.f32.mrf.mxu3 }
 0xbe9   :  { %v1434_v39 = vpop.eup %1433 }
 0xbea   :  { %513 = vrot.lane.b32.xlu0 %v1434_v39, %s1522_s27 }
 0xbeb   :  { %v1436_v41 = vpop.eup %1435 }
 0xbec   :  { %v494_v42 = vadd.f32 1.0, %v1436_v41 }
 0xbee   :  { %1437 = vrcp.f32 %v494_v42  ;;  %v506_v48 = vand.u32 2147483648, %v494_v42  ;;  %vm500_vm9 = vweird.f32 %v494_v42  ;;  %v504_v49 = vand.u32 2147483647, %v494_v42 }
 0xbf0   :  { %v507_v51 = vor.u32 1.1754944e-38, %v506_v48  ;;  %vm505_vm11 = vcmp.eq.f32.partialorder %v504_v49, 8.507059e+37 }
 0xbf2   :  { %209 = vrot.lane.b32.xlu0 %v1632_v35, %s1523_s30 }
 0xbf4   :  { %v1438_v43 = vpop.eup %1437 }
 0xbf5   :  { %v496_v44 = vmul.f32 %v1438_v43, %v494_v42  ;;  %vm501_vm8 = vweird.f32 %v1438_v43 }
 0xbf6   :  { %vm502_vm10 = vmor %vm500_vm9, %vm501_vm8 }
 0xbf7   :  { %v497_v45 = vsub.f32 1.0, %v496_v44 }
 0xbf9   :  { %v498_v46 = vmul.f32 %v1438_v43, %v497_v45 }
 0xbfb   :  { %v499_v47 = vadd.f32 %v1438_v43, %v498_v46 }
 0xbfd   :  { %v503_v50 = vsel %vm502_vm10, %v1438_v43, %v499_v47 }
 0xbfe   :  { %v508_v35 = vsel %vm505_vm11, %v507_v51, %v503_v50 }
 0xbff   :  { %v511_v57 = vmul.f32 %v508_v35, %v457_v26 }
 0xc5c   :  { %v514_v52 = vpop.permute.xlu0 %513 }
 0xc5d   :  { %v516_v53 = vmul.f32 %v514_v52, %v508_v35 }
 0xc5f   :  { %518 = vrot.lane.b32.xlu1 %v516_v53, %s1523_s30 }
 0xc64   :  { %v210_v54 = vpop.permute.xlu0 %209 }
 0xc65   :  { %212 = vst.msk [vmem:[#allocation3] sm:$0xff] %vm149_vm1, %v210_v54 }
 0xc67   :  { %273 = vrot.lane.b32.xlu1 %v1648_v1, %s1523_s30 }
 0xc6c   :  { %v661_v1 = vld [vmem:[#allocation3] sm:$0xff] }
 0xcd1   :  { %v519_v58 = vpop.permute.xlu1 %518 }
 0xcd2   :  { %v1702_v59 = vadd.f32 %v519_v58, %v511_v57 }
 0xcd4   :  { %1439 = vtanh.f32 %v1702_v59 }
 0xcd9   :  { %v274_v60 = vpop.permute.xlu1 %273 }
 0xcda   :  { %v1440_v61 = vpop.eup %1439  ;;  %276 = vst.msk [vmem:[#allocation3 + $0x8] sm:$0xff] %vm149_vm1, %v274_v60 }
 0xcdb   :  { %524 = vrot.lane.b32.xlu2 %v1440_v61, %s1522_s27 }
 0xce1   :  { %v662_v63 = vld [vmem:[#allocation3 + $0x8] sm:$0xff] }
 0xce2   :  { %v669_v0 = vpack.c.bf16 %v662_v63, %v661_v1 }
 0xce4   :  { %1336 = vmatmul.msk.bf16.vlgmr.msra.gmra.mxu3 %vm149_vm1, %v669_v0 }
 0xd35   :  { %v525_v2 = vpop.permute.xlu2 %524 }
 0xd36   :  { %v1708_v3 = vmul.f32 %v525_v2, %v508_v35 }
 0xd38   :  { %v534_v4 = vpack.c.bf16 %v1708_v3, %v1708_v3 }
 0xd3a   :  { %536 = vrot.lane.b32.xlu2 %v534_v4, %s1523_s30 }
 0xd67   :  { %v714_v19 = vpop.f32.mrf.mxu3 }
 0xd68   :  { %v715_v20 = vadd.f32 %v1749_v18, %v714_v19 }
 0xd94   :  { %v537_v9 = vpop.permute.xlu2 %536 }
 0xd95   :  { %1324 = vmatmul.msk.bf16.vlgmr.msra.gmra.mxu1 %vm149_vm1, %v537_v9 }
 0xd96   :  { %954 = vmatpush.bf16.msra.mxu1 %v1720_v7 }
 0xd9a   :  { %955 = vmatpush.bf16.msra.mxu1 %v1726_v8 }
 0xda5   :  { %1350 = vmatmul.msk.bf16.vlgmr.msrb.gmra.mxu1 %vm149_vm1, %v751_v11 }
 0xda6   :  { %1131 = vmatpush.bf16.msrb.mxu1 %v1720_v7 }
 0xdaa   :  { %1132 = vmatpush.bf16.msrb.mxu1 %v1726_v8 }
 0xe12   :  { %v550_v14 = vpop.f32.mrf.mxu1 }
 0xe13   :  { %v554_v15 = vadd.f32 %v550_v14, %v117_v13 }
 0xe15   :  { %1441 = vtanh.f32 %v554_v15  ;;  %v1325_v25 = vmul.f32 -1.442695, %v554_v15 }
 0xe1a   :  { %v552_v16 = vpop.f32.mrf.mxu1 }
 0xe1b   :  { %v1442_v17 = vpop.eup %1441 }
 0xe1c   :  { %577 = vrot.lane.b32.xlu0 %v1442_v17, %s1522_s27  ;;  %v716_v17 = vpop.f32.mrf.mxu3 }
 0xe1d   :  { %v717_v19 = vadd.f32 %v1749_v18, %v716_v17 }
 0xe22   :  { %v776_v6 = vpop.f32.mrf.mxu1 }
 0xe23   :  { %v780_v22 = vadd.f32 %v776_v6, %v715_v20 }
 0xe24   :  { %802 = vrot.lane.b32.xlu0 %v1341_v21, %s1523_s30 }
 0xe25   :  { %1443 = vtanh.f32 %v780_v22  ;;  %v1351_v28 = vmul.f32 -1.442695, %v780_v22 }
 0xe26   :  { %1445 = vpow2.f32 %v1325_v25 }
 0xe2a   :  { %v778_v23 = vpop.f32.mrf.mxu1 }
 0xe2b   :  { %v1444_v24 = vpop.eup %1443 }
 0xe2c   :  { %807 = vrot.lane.b32.xlu1 %v1444_v24, %s1522_s27  ;;  %v1446_v26 = vpop.eup %1445 }
 0xe2d   :  { %v558_v27 = vadd.f32 1.0, %v1446_v26 }
 0xe2f   :  { %1447 = vrcp.f32 %v558_v27  ;;  %v570_v40 = vand.u32 2147483648, %v558_v27  ;;  %vm564_vm12 = vweird.f32 %v558_v27  ;;  %v568_v41 = vand.u32 2147483647, %v558_v27 }
 0xe30   :  { %1449 = vpow2.f32 %v1351_v28 }
 0xe31   :  { %v571_v44 = vor.u32 1.1754944e-38, %v570_v40  ;;  %vm569_vm14 = vcmp.eq.f32.partialorder %v568_v41, 8.507059e+37 }
 0xe35   :  { %v1448_v30 = vpop.eup %1447 }
 0xe36   :  { %v1450_v32 = vpop.eup %1449  ;;  %v560_v33 = vmul.f32 %v1448_v30, %v558_v27  ;;  %vm565_vm0 = vweird.f32 %v1448_v30 }
 0xe37   :  { %v784_v34 = vadd.f32 1.0, %v1450_v32  ;;  %vm566_vm13 = vmor %vm564_vm12, %vm565_vm0 }
 0xe38   :  { %v561_v36 = vsub.f32 1.0, %v560_v33 }
 0xe39   :  { %1451 = vrcp.f32 %v784_v34  ;;  %v796_v51 = vand.u32 2147483648, %v784_v34  ;;  %vm790_vm2 = vweird.f32 %v784_v34  ;;  %v794_v52 = vand.u32 2147483647, %v784_v34 }
 0xe3a   :  { %v562_v37 = vmul.f32 %v1448_v30, %v561_v36 }
 0xe3b   :  { %v797_v53 = vor.u32 1.1754944e-38, %v796_v51  ;;  %vm795_vm4 = vcmp.eq.f32.partialorder %v794_v52, 8.507059e+37 }
 0xe3c   :  { %v563_v38 = vadd.f32 %v1448_v30, %v562_v37 }
 0xe3e   :  { %v567_v42 = vsel %vm566_vm13, %v1448_v30, %v563_v38 }
 0xe3f   :  { %v1452_v39 = vpop.eup %1451  ;;  %v572_v46 = vsel %vm569_vm14, %v571_v44, %v567_v42 }
 0xe40   :  { %v786_v43 = vmul.f32 %v1452_v39, %v784_v34  ;;  %vm791_vm15 = vweird.f32 %v1452_v39  ;;  %v575_v57 = vmul.f32 %v572_v46, %v1702_v59 }
 0xe41   :  { %vm792_vm3 = vmor %vm790_vm2, %vm791_vm15 }
 0xe42   :  { %v787_v48 = vsub.f32 1.0, %v786_v43 }
 0xe44   :  { %v788_v49 = vmul.f32 %v1452_v39, %v787_v48 }
 0xe46   :  { %v789_v50 = vadd.f32 %v1452_v39, %v788_v49 }
 0xe48   :  { %v793_v35 = vsel %vm792_vm3, %v1452_v39, %v789_v50  ;;  %v1792_v50 = vpop.f32.mrf.mxu0 }
 0xe49   :  { %v798_v54 = vsel %vm795_vm4, %v797_v53, %v793_v35 }
 0xe8e   :  { %v578_v45 = vpop.permute.xlu0 %577 }
 0xe8f   :  { %v580_v47 = vmul.f32 %v578_v45, %v572_v46 }
 0xe91   :  { %582 = vrot.lane.b32.xlu2 %v580_v47, %s1523_s30 }
 0xe96   :  { %v803_v1 = vpop.permute.xlu0 %802 }
 0xe97   :  { %v805_v63 = vmul.f32 %v803_v1, %v798_v54 }
 0xe9e   :  { %v808_v55 = vpop.permute.xlu1 %807 }
 0xe9f   :  { %v810_v56 = vmul.f32 %v808_v55, %v798_v54 }
 0xea1   :  { %812 = vrot.lane.b32.xlu1 %v810_v56, %s1523_s30 }
 0xeeb   :  { %v583_v58 = vpop.permute.xlu2 %582 }
 0xeec   :  { %v1760_v60 = vadd.f32 %v583_v58, %v575_v57 }
 0xeee   :  { %1453 = vtanh.f32 %v1760_v60 }
 0xef4   :  { %v1454_v61 = vpop.eup %1453 }
 0xef5   :  { %588 = vrot.lane.b32.xlu2 %v1454_v61, %s1522_s27 }
 0xf13   :  { %v813_v0 = vpop.permute.xlu1 %812 }
 0xf14   :  { %v815_v2 = vadd.f32 %v813_v0, %v805_v63 }
 0xf16   :  { %1455 = vtanh.f32 %v815_v2 }
 0xf1c   :  { %v1456_v4 = vpop.eup %1455 }
 0xf1d   :  { %818 = vrot.lane.b32.xlu0 %v1456_v4, %s1522_s27 }
 0xf4f   :  { %v589_v5 = vpop.permute.xlu2 %588 }
 0xf50   :  { %v1765_v9 = vmul.f32 %v589_v5, %v572_v46 }
 0xf52   :  { %v598_v59 = vpack.c.bf16 %v1765_v9, %v1765_v9 }
 0xf54   :  { %600 = vrot.lane.b32.xlu1 %v598_v59, %s1523_s30 }
 0xf8f   :  { %v819_v10 = vpop.permute.xlu0 %818 }
 0xf90   :  { %v821_v11 = vmul.f32 %v819_v10, %v798_v54 }
 0xf92   :  { %v823_v12 = vpack.c.bf16 %v821_v11, %v821_v11 }
 0xf94   :  { %825 = vrot.lane.b32.xlu2 %v823_v12, %s1523_s30 }
 0xfc6   :  { %v601_v13 = vpop.permute.xlu1 %600 }
 0xfc7   :  { %1326 = vmatmul.msk.bf16.vlgmr.msra.gmra.mxu2 %vm149_vm1, %v601_v13 }
 0xfc8   :  { %1013 = vmatpush.bf16.msra.mxu2 %v1720_v7 }
 0xfcc   :  { %1014 = vmatpush.bf16.msra.mxu2 %v1726_v8 }
 0xfee   :  { %v826_v14 = vpop.permute.xlu2 %825 }
 0xfef   :  { %1352 = vmatmul.msk.bf16.vlgmr.msrb.gmra.mxu2 %vm149_vm1, %v826_v14 }
 0xff0   :  { %1190 = vmatpush.bf16.msrb.mxu2 %v1720_v7 }
 0xff4   :  { %1191 = vmatpush.bf16.msrb.mxu2 %v1726_v8 }
0x104a   :  { %v1777_v15 = vpop.f32.mrf.mxu2 }
0x1052   :  { %v616_v16 = vpop.f32.mrf.mxu2 }
0x1072   :  { %v839_v20 = vpop.f32.mrf.mxu2 }
0x1073   :  { %v843_v21 = vadd.f32 %v839_v20, %v717_v19 }
0x1075   :  { %1457 = vtanh.f32 %v843_v21  ;;  %v1353_v23 = vmul.f32 -1.442695, %v843_v21 }
0x1077   :  { %1459 = vpow2.f32 %v1353_v23 }
0x107a   :  { %v841_v6 = vpop.f32.mrf.mxu2 }
0x107b   :  { %v1458_v22 = vpop.eup %1457 }
0x107c   :  { %866 = vrot.lane.b32.xlu0 %v1458_v22, %s1522_s27 }
0x107d   :  { %v1460_v7 = vpop.eup %1459 }
0x107e   :  { %v847_v8 = vadd.f32 1.0, %v1460_v7 }
0x1080   :  { %1461 = vrcp.f32 %v847_v8  ;;  %v859_v30 = vand.u32 2147483648, %v847_v8  ;;  %vm853_vm6 = vweird.f32 %v847_v8  ;;  %v857_v32 = vand.u32 2147483647, %v847_v8 }
0x1082   :  { %v860_v34 = vor.u32 1.1754944e-38, %v859_v30  ;;  %vm858_vm8 = vcmp.eq.f32.partialorder %v857_v32, 8.507059e+37 }
0x1084   :  { %337 = vrot.lane.b32.xlu0 %v1658_v31, %s1523_s30 }
0x1086   :  { %v1462_v24 = vpop.eup %1461 }
0x1087   :  { %v849_v25 = vmul.f32 %v1462_v24, %v847_v8  ;;  %vm854_vm5 = vweird.f32 %v1462_v24 }
0x1088   :  { %vm855_vm7 = vmor %vm853_vm6, %vm854_vm5 }
0x1089   :  { %v850_v26 = vsub.f32 1.0, %v849_v25 }
0x108b   :  { %v851_v27 = vmul.f32 %v1462_v24, %v850_v26 }
0x108d   :  { %v852_v28 = vadd.f32 %v1462_v24, %v851_v27 }
0x108f   :  { %v856_v33 = vsel %vm855_vm7, %v1462_v24, %v852_v28 }
0x1090   :  { %v861_v31 = vsel %vm858_vm8, %v860_v34, %v856_v33 }
0x1091   :  { %v864_v39 = vmul.f32 %v861_v31, %v815_v2 }
0x10ee   :  { %v867_v36 = vpop.permute.xlu0 %866 }
0x10ef   :  { %v869_v37 = vmul.f32 %v867_v36, %v861_v31 }
0x10f1   :  { %871 = vrot.lane.b32.xlu1 %v869_v37, %s1523_s30 }
0x10f6   :  { %v338_v38 = vpop.permute.xlu0 %337 }
0x10f7   :  { %340 = vst.msk [vmem:[#allocation3 + $0x10] sm:$0xff] %vm149_vm1, %v338_v38 }
0x10f9   :  { %401 = vrot.lane.b32.xlu1 %v1672_v62, %s1523_s30 }
0x10fe   :  { %v663_v44 = vld [vmem:[#allocation3 + $0x10] sm:$0xff] }
0x1163   :  { %v872_v40 = vpop.permute.xlu1 %871 }
0x1164   :  { %v874_v41 = vadd.f32 %v872_v40, %v864_v39 }
0x1166   :  { %1463 = vtanh.f32 %v874_v41 }
0x116b   :  { %v402_v42 = vpop.permute.xlu1 %401 }
0x116c   :  { %v1464_v43 = vpop.eup %1463  ;;  %404 = vst.msk [vmem:[#allocation3 + $0x18] sm:$0xff] %vm149_vm1, %v402_v42 }
0x116d   :  { %877 = vrot.lane.b32.xlu2 %v1464_v43, %s1522_s27 }
0x1173   :  { %v664_v45 = vld [vmem:[#allocation3 + $0x18] sm:$0xff] }
0x1174   :  { %v670_v46 = vpack.c.bf16 %v664_v45, %v663_v44 }
0x1176   :  { %1337 = vmatmul.msk.bf16.gmra.mxu3 %vm149_vm1, %v670_v46 }
0x11c7   :  { %v878_v47 = vpop.permute.xlu2 %877 }
0x11c8   :  { %v880_v48 = vmul.f32 %v878_v47, %v861_v31 }
0x11ca   :  { %v882_v49 = vpack.c.bf16 %v880_v48, %v880_v48 }
0x11cc   :  { %884 = vrot.lane.b32.xlu2 %v882_v49, %s1523_s30 }
0x11f9   :  { %v719_v51 = vpop.f32.mrf.mxu3 }
0x11fa   :  { %v720_v52 = vadd.f32 %v1749_v18, %v719_v51 }
0x1201   :  { %v721_v23 = vpop.f32.mrf.mxu3 }
0x1202   :  { %v722_v7 = vadd.f32 %v1749_v18, %v721_v23 }
0x1226   :  { %v885_v62 = vpop.permute.xlu2 %884 }
0x1227   :  { %1354 = vmatmul.msk.bf16.vlgmr.msrb.gmra.mxu0 %vm149_vm1, %v885_v62 }
0x12a4   :  { %v898_v35 = vpop.f32.mrf.mxu0 }
0x12a5   :  { %v902_v53 = vadd.f32 %v898_v35, %v720_v52 }
0x12a7   :  { %1465 = vtanh.f32 %v902_v53  ;;  %v1355_v56 = vmul.f32 -1.442695, %v902_v53 }
0x12a9   :  { %1467 = vpow2.f32 %v1355_v56 }
0x12ac   :  { %v900_v54 = vpop.f32.mrf.mxu0 }
0x12ad   :  { %v1466_v55 = vpop.eup %1465 }
0x12ae   :  { %925 = vrot.lane.b32.xlu0 %v1466_v55, %s1522_s27 }
0x12af   :  { %v1468_v57 = vpop.eup %1467 }
0x12b0   :  { %v906_v58 = vadd.f32 1.0, %v1468_v57 }
0x12b2   :  { %1469 = vrcp.f32 %v906_v58  ;;  %v918_v4 = vand.u32 2147483648, %v906_v58  ;;  %vm912_vm10 = vweird.f32 %v906_v58  ;;  %v916_v5 = vand.u32 2147483647, %v906_v58 }
0x12b4   :  { %v919_v10 = vor.u32 1.1754944e-38, %v918_v4  ;;  %vm917_vm0 = vcmp.eq.f32.partialorder %v916_v5, 8.507059e+37 }
0x12b8   :  { %v1470_v61 = vpop.eup %1469 }
0x12b9   :  { %v908_v1 = vmul.f32 %v1470_v61, %v906_v58  ;;  %vm913_vm9 = vweird.f32 %v1470_v61 }
0x12ba   :  { %vm914_vm11 = vmor %vm912_vm10, %vm913_vm9 }
0x12bb   :  { %v909_v63 = vsub.f32 1.0, %v908_v1 }
0x12bd   :  { %v910_v0 = vmul.f32 %v1470_v61, %v909_v63 }
0x12bf   :  { %v911_v2 = vadd.f32 %v1470_v61, %v910_v0 }
0x12c1   :  { %v915_v59 = vsel %vm914_vm11, %v1470_v61, %v911_v2 }
0x12c2   :  { %v920_v12 = vsel %vm917_vm0, %v919_v10, %v915_v59 }
0x12c3   :  { %v923_v14 = vmul.f32 %v920_v12, %v874_v41 }
0x1320   :  { %v926_v11 = vpop.permute.xlu0 %925 }
0x1321   :  { %v928_v13 = vmul.f32 %v926_v11, %v920_v12 }
0x1323   :  { %930 = vrot.lane.b32.xlu1 %v928_v13, %s1523_s30 }
0x1395   :  { %v931_v16 = vpop.permute.xlu1 %930 }
0x1396   :  { %v933_v17 = vadd.f32 %v931_v16, %v923_v14  ;;  %v1521_v14 = vld [vmem:[%s1872_s3] ss:$0 sm:$0xff] }
0x1397   :  { %v119_v16 = vadd.f32 %v1521_v14, %v1792_v50 }
0x1398   :  { %1471 = vtanh.f32 %v933_v17 }
0x139e   :  { %v1472_v19 = vpop.eup %1471 }
0x139f   :  { %936 = vrot.lane.b32.xlu2 %v1472_v19, %s1522_s27  ;;  %v618_v19 = vadd.f32 %v1777_v15, %v119_v16 }
0x13f9   :  { %v937_v20 = vpop.permute.xlu2 %936 }
0x13fa   :  { %v939_v21 = vmul.f32 %v937_v20, %v920_v12 }
0x13fc   :  { %v941_v6 = vpack.c.bf16 %v939_v21, %v939_v21 }
0x13fe   :  { %943 = vrot.lane.b32.xlu0 %v941_v6, %s1523_s30 }
0x1470   :  { %v944_v22 = vpop.permute.xlu0 %943 }
0x1471   :  { %1356 = vmatmul.msk.bf16.vlgmr.msra.gmra.mxu1 %vm149_vm1, %v944_v22 }
0x14ee   :  { %v957_v8 = vpop.f32.mrf.mxu1 }
0x14ef   :  { %v961_v24 = vadd.f32 %v957_v8, %v722_v7 }
0x14f1   :  { %1473 = vtanh.f32 %v961_v24  ;;  %v1357_v27 = vmul.f32 -1.442695, %v961_v24  ;;  %v1327_v24 = vmul.f32 -1.442695, %v618_v19 }
0x14f3   :  { %1475 = vpow2.f32 %v1357_v27 }
0x14f6   :  { %v959_v25 = vpop.f32.mrf.mxu1 }
0x14f7   :  { %v1474_v26 = vpop.eup %1473 }
0x14f8   :  { %984 = vrot.lane.b32.xlu1 %v1474_v26, %s1522_s27 }
0x14f9   :  { %v1476_v28 = vpop.eup %1475 }
0x14fa   :  { %v965_v30 = vadd.f32 1.0, %v1476_v28 }
0x14fc   :  { %1477 = vrcp.f32 %v965_v30  ;;  %v977_v37 = vand.u32 2147483648, %v965_v30  ;;  %vm971_vm13 = vweird.f32 %v965_v30  ;;  %v975_v38 = vand.u32 2147483647, %v965_v30 }
0x14fe   :  { %v978_v40 = vor.u32 1.1754944e-38, %v977_v37  ;;  %vm976_vm15 = vcmp.eq.f32.partialorder %v975_v38, 8.507059e+37 }
0x1500   :  { %465 = vrot.lane.b32.xlu1 %v1682_v29, %s1523_s30 }
0x1502   :  { %v1478_v32 = vpop.eup %1477 }
0x1503   :  { %v967_v33 = vmul.f32 %v1478_v32, %v965_v30  ;;  %vm972_vm12 = vweird.f32 %v1478_v32 }
0x1504   :  { %vm973_vm14 = vmor %vm971_vm13, %vm972_vm12 }
0x1505   :  { %v968_v34 = vsub.f32 1.0, %v967_v33 }
0x1507   :  { %v969_v36 = vmul.f32 %v1478_v32, %v968_v34 }
0x1509   :  { %v970_v31 = vadd.f32 %v1478_v32, %v969_v36 }
0x150b   :  { %v974_v39 = vsel %vm973_vm14, %v1478_v32, %v970_v31 }
0x150c   :  { %v979_v29 = vsel %vm976_vm15, %v978_v40, %v974_v39 }
0x150d   :  { %v982_v44 = vmul.f32 %v979_v29, %v933_v17 }
0x156a   :  { %v985_v41 = vpop.permute.xlu1 %984 }
0x156b   :  { %v987_v42 = vmul.f32 %v985_v41, %v979_v29 }
0x156d   :  { %989 = vrot.lane.b32.xlu2 %v987_v42, %s1523_s30 }
0x1572   :  { %v466_v43 = vpop.permute.xlu1 %465 }
0x1573   :  { %468 = vst.msk [vmem:[#allocation3 + $0x20] sm:$0xff] %vm149_vm1, %v466_v43 }
0x1575   :  { %529 = vrot.lane.b32.xlu2 %v1708_v3, %s1523_s30 }
0x157a   :  { %v665_v49 = vld [vmem:[#allocation3 + $0x20] sm:$0xff] }
0x15c7   :  { %v990_v45 = vpop.permute.xlu2 %989 }
0x15c8   :  { %v992_v46 = vadd.f32 %v990_v45, %v982_v44 }
0x15ca   :  { %1479 = vtanh.f32 %v992_v46 }
0x15cf   :  { %v530_v47 = vpop.permute.xlu2 %529 }
0x15d0   :  { %v1480_v48 = vpop.eup %1479  ;;  %532 = vst.msk [vmem:[#allocation3 + $0x28] sm:$0xff] %vm149_vm1, %v530_v47 }
0x15d1   :  { %995 = vrot.lane.b32.xlu0 %v1480_v48, %s1522_s27 }
0x15d7   :  { %v666_v62 = vld [vmem:[#allocation3 + $0x28] sm:$0xff] }
0x15d8   :  { %v671_v51 = vpack.c.bf16 %v666_v62, %v665_v49 }
0x15da   :  { %1338 = vmatmul.msk.bf16.gmra.mxu3 %vm149_vm1, %v671_v51 }
0x1643   :  { %v996_v52 = vpop.permute.xlu0 %995 }
0x1644   :  { %v998_v35 = vmul.f32 %v996_v52, %v979_v29 }
0x1646   :  { %v1000_v53 = vpack.c.bf16 %v998_v35, %v998_v35 }
0x1648   :  { %1002 = vrot.lane.b32.xlu0 %v1000_v53, %s1523_s30 }
0x165d   :  { %v724_v54 = vpop.f32.mrf.mxu3 }
0x165e   :  { %v725_v55 = vadd.f32 %v1749_v18, %v724_v54 }
0x1665   :  { %v726_v43 = vpop.f32.mrf.mxu3 }
0x1666   :  { %v727_v44 = vadd.f32 %v1749_v18, %v726_v43 }
0x16ba   :  { %v1003_v3 = vpop.permute.xlu0 %1002 }
0x16bb   :  { %1358 = vmatmul.msk.bf16.vlgmr.msra.gmra.mxu2 %vm149_vm1, %v1003_v3 }
0x173e   :  { %v1016_v56 = vpop.f32.mrf.mxu2 }
0x173f   :  { %v1020_v57 = vadd.f32 %v1016_v56, %v725_v55 }
0x1741   :  { %1481 = vtanh.f32 %v1020_v57  ;;  %v1359_v1 = vmul.f32 -1.442695, %v1020_v57 }
0x1743   :  { %1483 = vpow2.f32 %v1359_v1 }
0x1746   :  { %v1018_v58 = vpop.f32.mrf.mxu2 }
0x1747   :  { %v1482_v61 = vpop.eup %1481 }
0x1748   :  { %1043 = vrot.lane.b32.xlu1 %v1482_v61, %s1522_s27 }
0x1749   :  { %v1484_v63 = vpop.eup %1483 }
0x174a   :  { %v1024_v0 = vadd.f32 1.0, %v1484_v63 }
0x174c   :  { %1485 = vrcp.f32 %v1024_v0  ;;  %v1036_v11 = vand.u32 2147483648, %v1024_v0  ;;  %vm1030_vm3 = vweird.f32 %v1024_v0  ;;  %v1034_v12 = vand.u32 2147483647, %v1024_v0 }
0x174d   :  { %1487 = vtanh.f32 %v618_v19 }
0x174e   :  { %v1037_v17 = vor.u32 1.1754944e-38, %v1036_v11  ;;  %vm1035_vm5 = vcmp.eq.f32.partialorder %v1034_v12, 8.507059e+37 }
0x1752   :  { %v1486_v2 = vpop.eup %1485 }
0x1753   :  { %v1026_v4 = vmul.f32 %v1486_v2, %v1024_v0  ;;  %vm1031_vm2 = vweird.f32 %v1486_v2  ;;  %v1488_v22 = vpop.eup %1487 }
0x1754   :  { %vm1032_vm4 = vmor %vm1030_vm3, %vm1031_vm2 }
0x1755   :  { %v1027_v5 = vsub.f32 1.0, %v1026_v4 }
0x1757   :  { %v1028_v59 = vmul.f32 %v1486_v2, %v1027_v5 }
0x1759   :  { %v1029_v10 = vadd.f32 %v1486_v2, %v1028_v59 }
0x175b   :  { %v1033_v13 = vsel %vm1032_vm4, %v1486_v2, %v1029_v10 }
0x175c   :  { %v1038_v21 = vsel %vm1035_vm5, %v1037_v17, %v1033_v13 }
0x175d   :  { %v1041_v23 = vmul.f32 %v1038_v21, %v992_v46 }
0x17ba   :  { %v1044_v20 = vpop.permute.xlu1 %1043 }
0x17bb   :  { %v1046_v6 = vmul.f32 %v1044_v20, %v1038_v21 }
0x17bd   :  { %1048 = vrot.lane.b32.xlu2 %v1046_v6, %s1523_s30 }
0x17c5   :  { %641 = vrot.lane.b32.xlu2 %v1488_v22, %s1522_s27 }
0x1817   :  { %v1049_v7 = vpop.permute.xlu2 %1048 }
0x1818   :  { %v1822_v8 = vadd.f32 %v1049_v7, %v1041_v23 }
0x181a   :  { %1489 = vtanh.f32 %v1822_v8 }
0x181b   :  { %1491 = vpow2.f32 %v1327_v24 }
0x181f   :  { %v642_v40 = vpop.permute.xlu2 %641 }
0x1820   :  { %v1490_v50 = vpop.eup %1489 }
0x1821   :  { %1054 = vrot.lane.b32.xlu0 %v1490_v50, %s1522_s27  ;;  %v1492_v15 = vpop.eup %1491 }
0x1822   :  { %v622_v25 = vadd.f32 1.0, %v1492_v15 }
0x1824   :  { %1493 = vrcp.f32 %v622_v25  ;;  %v634_v31 = vand.u32 2147483648, %v622_v25  ;;  %vm628_vm7 = vweird.f32 %v622_v25  ;;  %v632_v37 = vand.u32 2147483647, %v622_v25 }
0x1826   :  { %v635_v39 = vor.u32 1.1754944e-38, %v634_v31  ;;  %vm633_vm9 = vcmp.eq.f32.partialorder %v632_v37, 8.507059e+37 }
0x182a   :  { %v1494_v26 = vpop.eup %1493 }
0x182b   :  { %v624_v27 = vmul.f32 %v1494_v26, %v622_v25  ;;  %vm629_vm6 = vweird.f32 %v1494_v26 }
0x182c   :  { %vm630_vm8 = vmor %vm628_vm7, %vm629_vm6 }
0x182d   :  { %v625_v28 = vsub.f32 1.0, %v624_v27 }
0x182f   :  { %v626_v30 = vmul.f32 %v1494_v26, %v625_v28 }
0x1831   :  { %v627_v34 = vadd.f32 %v1494_v26, %v626_v30 }
0x1833   :  { %v631_v38 = vsel %vm630_vm8, %v1494_v26, %v627_v34 }
0x1834   :  { %v636_v41 = vsel %vm633_vm9, %v635_v39, %v631_v38 }
0x1835   :  { %v644_v29 = vmul.f32 %v642_v40, %v636_v41  ;;  %v639_v48 = vmul.f32 %v636_v41, %v1760_v60 }
0x1893   :  { %v1055_v32 = vpop.permute.xlu0 %1054 }
0x1894   :  { %v1057_v33 = vmul.f32 %v1055_v32, %v1038_v21 }
0x1896   :  { %v1059_v36 = vpack.c.bf16 %v1057_v33, %v1057_v33 }
0x1898   :  { %1061 = vrot.lane.b32.xlu1 %v1059_v36, %s1523_s30 }
0x18a0   :  { %646 = vrot.lane.b32.xlu1 %v644_v29, %s1523_s30 }
0x190a   :  { %v1062_v42 = vpop.permute.xlu1 %1061 }
0x190b   :  { %1360 = vmatmul.msk.bf16.vlgmr.msra.gmra.mxu0 %vm149_vm1, %v1062_v42 }
0x1912   :  { %v647_v47 = vpop.permute.xlu1 %646 }
0x1913   :  { %v649_v49 = vadd.f32 %v647_v47, %v639_v48 }
0x1988   :  { %v1075_v45 = vpop.f32.mrf.mxu0 }
0x1989   :  { %v1079_v46 = vadd.f32 %v1075_v45, %v727_v44 }
0x198b   :  { %1495 = vtanh.f32 %v1079_v46  ;;  %v1361_v35 = vmul.f32 -1.442695, %v1079_v46 }
0x198c   :  { %1497 = vtanh.f32 %v649_v49 }
0x198d   :  { %1499 = vpow2.f32 %v1361_v35 }
0x1990   :  { %v1077_v62 = vpop.f32.mrf.mxu0 }
0x1991   :  { %v1496_v51 = vpop.eup %1495 }
0x1992   :  { %1102 = vrot.lane.b32.xlu0 %v1496_v51, %s1522_s27  ;;  %v1498_v52 = vpop.eup %1497 }
0x1993   :  { %v1500_v53 = vpop.eup %1499 }
0x1994   :  { %v1083_v3 = vadd.f32 1.0, %v1500_v53 }
0x1996   :  { %1501 = vrcp.f32 %v1083_v3  ;;  %v1095_v60 = vand.u32 2147483648, %v1083_v3  ;;  %vm1089_vm11 = vweird.f32 %v1083_v3  ;;  %v1093_v61 = vand.u32 2147483647, %v1083_v3 }
0x1998   :  { %v1096_v63 = vor.u32 1.1754944e-38, %v1095_v60  ;;  %vm1094_vm12 = vcmp.eq.f32.partialorder %v1093_v61, 8.507059e+37 }
0x199a   :  { %652 = vrot.lane.b32.xlu0 %v1498_v52, %s1522_s27 }
0x199c   :  { %v1502_v54 = vpop.eup %1501 }
0x199d   :  { %v1085_v55 = vmul.f32 %v1502_v54, %v1083_v3  ;;  %vm1090_vm10 = vweird.f32 %v1502_v54 }
0x199e   :  { %vm1091_vm0 = vmor %vm1089_vm11, %vm1090_vm10 }
0x199f   :  { %v1086_v56 = vsub.f32 1.0, %v1085_v55 }
0x19a1   :  { %v1087_v57 = vmul.f32 %v1502_v54, %v1086_v56 }
0x19a3   :  { %v1088_v58 = vadd.f32 %v1502_v54, %v1087_v57 }
0x19a5   :  { %v1092_v1 = vsel %vm1091_vm0, %v1502_v54, %v1088_v58 }
0x19a6   :  { %v1097_v2 = vsel %vm1094_vm12, %v1096_v63, %v1092_v1 }
0x19a7   :  { %v1100_v10 = vmul.f32 %v1097_v2, %v1822_v8 }
0x1a04   :  { %v1103_v0 = vpop.permute.xlu0 %1102 }
0x1a05   :  { %v1105_v4 = vmul.f32 %v1103_v0, %v1097_v2 }
0x1a07   :  { %1107 = vrot.lane.b32.xlu2 %v1105_v4, %s1523_s30 }
0x1a0c   :  { %v653_v5 = vpop.permute.xlu0 %652 }
0x1a0d   :  { %v655_v59 = vmul.f32 %v653_v5, %v636_v41 }
0x1a0f   :  { %593 = vrot.lane.b32.xlu2 %v1765_v9, %s1523_s30  ;;  %657 = vrot.lane.b32.xlu0 %v655_v59, %s1523_s30 }
0x1a61   :  { %v1108_v11 = vpop.permute.xlu2 %1107 }
0x1a62   :  { %v1110_v12 = vadd.f32 %v1108_v11, %v1100_v10 }
0x1a64   :  { %1503 = vtanh.f32 %v1110_v12 }
0x1a69   :  { %v594_v13 = vpop.permute.xlu2 %593 }
0x1a6a   :  { %v1504_v14 = vpop.eup %1503  ;;  %596 = vst.msk [vmem:[#allocation3 + $0x30] sm:$0xff] %vm149_vm1, %v594_v13  ;;  %v1387_v13 = vld [vmem:[%s1877_s9 + $0x8] sm:$0xff] }
0x1a6b   :  { %1113 = vrot.lane.b32.xlu1 %v1504_v14, %s1522_s27  ;;  %1268 = vmatpush.bf16.msrb.mxu0 %v1387_v13  ;;  %v1386_v14 = vld [vmem:[%s1877_s9] sm:$0xff] }
0x1a6f   :  { %1269 = vmatpush.bf16.msrb.mxu0 %v1386_v14 }
0x1a71   :  { %v667_v17 = vld [vmem:[#allocation3 + $0x30] sm:$0xff] }
0x1a81   :  { %v658_v16 = vpop.permute.xlu0 %657 }
0x1a82   :  { %660 = vst.msk [vmem:[#allocation3 + $0x38] sm:$0xff] %vm149_vm1, %v658_v16 }
0x1a89   :  { %v668_v19 = vld [vmem:[#allocation3 + $0x38] sm:$0xff] }
0x1a8a   :  { %v672_v20 = vpack.c.bf16 %v668_v19, %v667_v17 }
0x1a8c   :  { %1339 = vmatmul.msk.bf16.gmra.mxu3 %vm149_vm1, %v672_v20 }
0x1add   :  { %v1114_v9 = vpop.permute.xlu1 %1113 }
0x1ade   :  { %v1116_v21 = vmul.f32 %v1114_v9, %v1097_v2  ;;  %v1392_v9 = vld [vmem:[%s1878_s10] ss:$0 sm:$0xff] }
0x1ae0   :  { %v1118_v6 = vpack.c.bf16 %v1116_v21, %v1116_v21 }
0x1ae2   :  { %1120 = vrot.lane.b32.xlu1 %v1118_v6, %s1523_s30 }
0x1b0f   :  { %v729_v23 = vpop.f32.mrf.mxu3 }
0x1b10   :  { %v730_v7 = vadd.f32 %v1749_v18, %v729_v23 }
0x1b17   :  { %v731_v49 = vpop.f32.mrf.mxu3 }
0x1b18   :  { %v732_v62 = vadd.f32 %v1749_v18, %v731_v49 }
0x1b54   :  { %v1121_v22 = vpop.permute.xlu1 %1120 }
0x1b55   :  { %1362 = vmatmul.msk.bf16.vlgmr.msrb.gmra.mxu1 %vm149_vm1, %v1121_v22 }
0x1bd2   :  { %v1134_v8 = vpop.f32.mrf.mxu1 }
0x1bd3   :  { %v1138_v50 = vadd.f32 %v1134_v8, %v730_v7 }
0x1bd5   :  { %1505 = vtanh.f32 %v1138_v50  ;;  %v1363_v25 = vmul.f32 -1.442695, %v1138_v50 }
0x1bd7   :  { %1507 = vpow2.f32 %v1363_v25 }
0x1bda   :  { %v1136_v24 = vpop.f32.mrf.mxu1 }
0x1bdb   :  { %v1506_v15 = vpop.eup %1505 }
0x1bdc   :  { %1161 = vrot.lane.b32.xlu2 %v1506_v15, %s1522_s27 }
0x1bdd   :  { %v1508_v26 = vpop.eup %1507 }
0x1bde   :  { %v1142_v27 = vadd.f32 1.0, %v1508_v26 }
0x1be0   :  { %1509 = vrcp.f32 %v1142_v27  ;;  %v1154_v36 = vand.u32 2147483648, %v1142_v27  ;;  %vm1148_vm14 = vweird.f32 %v1142_v27  ;;  %v1152_v31 = vand.u32 2147483647, %v1142_v27 }
0x1be2   :  { %v1155_v38 = vor.u32 1.1754944e-38, %v1154_v36  ;;  %vm1153_vm2 = vcmp.eq.f32.partialorder %v1152_v31, 8.507059e+37 }
0x1be6   :  { %v1510_v28 = vpop.eup %1509 }
0x1be7   :  { %v1144_v30 = vmul.f32 %v1510_v28, %v1142_v27  ;;  %vm1149_vm13 = vweird.f32 %v1510_v28 }
0x1be8   :  { %vm1150_vm15 = vmor %vm1148_vm14, %vm1149_vm13 }
0x1be9   :  { %v1145_v32 = vsub.f32 1.0, %v1144_v30 }
0x1beb   :  { %v1146_v33 = vmul.f32 %v1510_v28, %v1145_v32 }
0x1bed   :  { %v1147_v34 = vadd.f32 %v1510_v28, %v1146_v33 }
0x1bef   :  { %v1151_v37 = vsel %vm1150_vm15, %v1510_v28, %v1147_v34 }
0x1bf0   :  { %v1156_v40 = vsel %vm1153_vm2, %v1155_v38, %v1151_v37 }
0x1bf1   :  { %v1159_v29 = vmul.f32 %v1156_v40, %v1110_v12 }
0x1c36   :  { %v1162_v39 = vpop.permute.xlu2 %1161 }
0x1c37   :  { %v1164_v41 = vmul.f32 %v1162_v39, %v1156_v40 }
0x1c39   :  { %1166 = vrot.lane.b32.xlu0 %v1164_v41, %s1523_s30 }
0x1cab   :  { %v1167_v42 = vpop.permute.xlu0 %1166 }
0x1cac   :  { %v1169_v43 = vadd.f32 %v1167_v42, %v1159_v29 }
0x1cae   :  { %1511 = vtanh.f32 %v1169_v43 }
0x1cb4   :  { %v1512_v44 = vpop.eup %1511 }
0x1cb5   :  { %1172 = vrot.lane.b32.xlu1 %v1512_v44, %s1522_s27 }
0x1d27   :  { %v1173_v45 = vpop.permute.xlu1 %1172 }
0x1d28   :  { %v1175_v46 = vmul.f32 %v1173_v45, %v1156_v40 }
0x1d2a   :  { %v1177_v47 = vpack.c.bf16 %v1175_v46, %v1175_v46 }
0x1d2c   :  { %1179 = vrot.lane.b32.xlu2 %v1177_v47, %s1523_s30 }
0x1d86   :  { %v1180_v48 = vpop.permute.xlu2 %1179 }
0x1d87   :  { %1364 = vmatmul.msk.bf16.vlgmr.msrb.gmra.mxu2 %vm149_vm1, %v1180_v48 }
0x1e0a   :  { %v1193_v51 = vpop.f32.mrf.mxu2 }
0x1e0b   :  { %v1197_v52 = vadd.f32 %v1193_v51, %v732_v62 }
0x1e0d   :  { %1513 = vtanh.f32 %v1197_v52  ;;  %v1365_v3 = vmul.f32 -1.442695, %v1197_v52 }
0x1e0f   :  { %1515 = vpow2.f32 %v1365_v3 }
0x1e12   :  { %v1195_v35 = vpop.f32.mrf.mxu2 }
0x1e13   :  { %v1514_v53 = vpop.eup %1513 }
0x1e14   :  { %1220 = vrot.lane.b32.xlu0 %v1514_v53, %s1522_s27 }
0x1e15   :  { %v1516_v54 = vpop.eup %1515 }
0x1e16   :  { %v1201_v55 = vadd.f32 1.0, %v1516_v54 }
0x1e18   :  { %1517 = vrcp.f32 %v1201_v55  ;;  %v1213_v1 = vand.u32 2147483648, %v1201_v55  ;;  %vm1207_vm4 = vweird.f32 %v1201_v55  ;;  %v1211_v18 = vand.u32 2147483647, %v1201_v55 }
0x1e1a   :  { %v1214_v0 = vor.u32 1.1754944e-38, %v1213_v1  ;;  %vm1212_vm6 = vcmp.eq.f32.partialorder %v1211_v18, 8.507059e+37 }
0x1e1e   :  { %v1518_v56 = vpop.eup %1517 }
0x1e1f   :  { %v1203_v57 = vmul.f32 %v1518_v56, %v1201_v55  ;;  %vm1208_vm3 = vweird.f32 %v1518_v56 }
0x1e20   :  { %vm1209_vm5 = vmor %vm1207_vm4, %vm1208_vm3 }
0x1e21   :  { %v1204_v58 = vsub.f32 1.0, %v1203_v57 }
0x1e23   :  { %v1205_v60 = vmul.f32 %v1518_v56, %v1204_v58 }
0x1e25   :  { %v1206_v61 = vadd.f32 %v1518_v56, %v1205_v60 }
0x1e27   :  { %v1210_v63 = vsel %vm1209_vm5, %v1518_v56, %v1206_v61 }
0x1e28   :  { %v1215_v4 = vsel %vm1212_vm6, %v1214_v0, %v1210_v63 }
0x1e29   :  { %v1218_v59 = vmul.f32 %v1215_v4, %v1169_v43 }
0x1e86   :  { %v1221_v2 = vpop.permute.xlu0 %1220 }
0x1e87   :  { %v1223_v5 = vmul.f32 %v1221_v2, %v1215_v4 }
0x1e89   :  { %1225 = vrot.lane.b32.xlu1 %v1223_v5, %s1523_s30 }
0x1efb   :  { %v1226_v10 = vpop.permute.xlu1 %1225 }
0x1efc   :  { %v1228_v11 = vadd.f32 %v1226_v10, %v1218_v59 }
0x1efe   :  { %1519 = vtanh.f32 %v1228_v11 }
0x1f04   :  { %v1520_v12 = vpop.eup %1519 }
0x1f05   :  { %1231 = vrot.lane.b32.xlu2 %v1520_v12, %s1522_s27 }
0x1f5f   :  { %v1232_v16 = vpop.permute.xlu2 %1231 }
0x1f60   :  { %v1234_v17 = vmul.f32 %v1232_v16, %v1215_v4 }
0x1f62   :  { %v1235_v19 = vpack.c.bf16 %v1234_v17, %v1234_v17 }
0x1f64   :  { %1245 = vrot.lane.b32.xlu0 %v1235_v19, %s1523_s30 }
0x1fd6   :  { %v1246_v20 = vpop.permute.xlu0 %1245 }
0x1fd7   :  { %1374 = vmatmul.msk.bf16.vlgmr.msrb.gmra.mxu0 %vm149_vm1, %v1246_v20 }
0x2054   :  { %v1271_v21 = vpop.f32.mrf.mxu0 }
0x2055   :  { %v1272_v6 = vadd.f32 %v1392_v9, %v1271_v21 }
0x2057   :  { %1275 = vst [vmem:[%s1879_s11] sm:$0xff] %v1272_v6 }
0x205c   :  { %v1273_v22 = vpop.f32.mrf.mxu0 }

</bundles_post_ra>
